<compile_context>
chip_gen: v7x
topology: tpu7x:2x2x1
jax: 0.10.0
libtpu: 0.0.40
codegen_flags: <defaults>
</compile_context>

<pallas_src>
import jax
import jax.numpy as jnp
from jax import lax
from jax.experimental import pallas as pl
from jax.experimental.pallas import tpu as pltpu

V_THRESHOLD = 1.0   # ParametricLIFNode default v_threshold
BN_EPS = 1e-5       # nn.BatchNorm2d default eps


def _make_kernel(T, H, W, Cin_p, Cmid):
    HW = H * W

    def kernel(sws_ref, x_ref, w1_ref, b1_ref, w2_ref, b2_ref, o_ref, u1_ref):
        # sws_ref : SMEM [2]            sigmoid(w_plif1), sigmoid(w_plif2)
        # x_ref   : [T, 1, Cin_p, HW]   one batch element, all timesteps
        # w1_ref  : [Cmid, 9*Cin_p]     bf16 conv1 weights, BN1 scale folded in
        # b1_ref  : [Cmid, 1]           f32 folded BN1 bias
        # w2_ref  : [Cin_p, 9*Cmid]     bf16 conv2 weights, BN2 scale folded in
        # b2_ref  : [Cin_p, 1]          f32 folded BN2 bias
        # o_ref   : [T, 1, Cin_p, HW]   bf16 output spikes
        # u1_ref  : VMEM [T, Cmid, HW]  f32 scratch: conv1+BN1 for all timesteps
        sw1 = sws_ref[0]
        sw2 = sws_ref[1]

        # ---- hoisted constants: per-tap zero-padding masks -----------------
        lane = lax.broadcasted_iota(jnp.int32, (1, HW), 1)
        col = lane % W
        shifts, masks = [], []
        for dy in range(3):
            for dx in range(3):
                oy, ox = dy - 1, dx - 1
                s = oy * W + ox
                flat_ok = jnp.logical_and(lane + s >= 0, lane + s < HW)
                col_ok = jnp.logical_and(col + ox >= 0, col + ox <= W - 1)
                shifts.append(s)
                masks.append(jnp.logical_and(flat_ok, col_ok).astype(jnp.float32))

        def im2col(a):
            # a: [C, HW] -> [9*C, HW]; rows (dy,dx)-major, channel-minor,
            # matching the folded-weight layout built in the wrapper.
            # Shifts go through the XLU via pltpu.roll; wrapped / out-of-image
            # lanes are re-zeroed by the precomputed masks.
            rows = []
            for s, m in zip(shifts, masks):
                if s == 0:
                    rows.append(a)
                else:
                    rows.append(pltpu.roll(a, (-s) % HW, axis=1) * m)
            return jnp.concatenate(rows, axis=0)

        # ---- hoisted weight loads / bias broadcast (NOT re-read per step) --
        w1 = w1_ref[...]                                       # [Cmid, 9*Cin_p] bf16
        w2 = w2_ref[...]                                       # [Cin_p, 9*Cmid] bf16
        b2 = jnp.broadcast_to(b2_ref[...], (Cin_p, HW))        # [Cin_p, HW] f32

        # ---- conv1 + BN1 for ALL timesteps: one wide MXU matmul ------------
        rhs1 = jnp.concatenate(
            [im2col(x_ref[t, 0]).astype(jnp.bfloat16) for t in range(T)],
            axis=1)                                            # [9*Cin_p, T*HW]
        u1_all = jnp.dot(w1, rhs1,
                         preferred_element_type=jnp.float32) + b1_ref[...]
        for t in range(T):                                     # static, lane-aligned
            u1_ref[t] = u1_all[:, t * HW:(t + 1) * HW]

        # ---- sequential recurrence: PLIF1 -> conv2+BN2 -> residual -> PLIF2
        def step(t, carry):
            v1, v2 = carry
            # PLIF1 (decay_input=True, hard reset, v_reset = 0)
            u1 = u1_ref[t]                                     # [Cmid, HW]
            v1 = v1 + (u1 - v1) * sw1
            s1 = (v1 >= V_THRESHOLD).astype(jnp.float32)
            v1 = v1 * (1.0 - s1)
            # conv2 + BN2 (spikes are exact in bf16), residual add, PLIF2
            u2 = jnp.dot(w2, im2col(s1).astype(jnp.bfloat16),
                         preferred_element_type=jnp.float32) + b2
            xt = x_ref[t, 0]                                   # [Cin_p, HW]
            v2 = v2 + ((xt + u2) - v2) * sw2
            s2 = (v2 >= V_THRESHOLD).astype(jnp.float32)
            v2 = v2 * (1.0 - s2)
            o_ref[t, 0] = s2.astype(o_ref.dtype)
            return v1, v2

        lax.fori_loop(
            0, T, step,
            (jnp.zeros((Cmid, HW), jnp.float32),
             jnp.zeros((Cin_p, HW), jnp.float32)),
            unroll=min(T, 4),
        )

    return kernel


def basic_block_forward(x, p):
    # x: [T, N, Cin, H, W] -> spikes [T, N, Cin, H, W] (float32)
    T, N, Cin, H, W = x.shape
    Cmid = p["w1"].shape[0]
    HW = H * W
    Cin_p = ((Cin + 7) // 8) * 8          # pad channels to full 8-sublane vregs
    pad = Cin_p - Cin

    # Fold BatchNorm (inference stats) into conv weights / per-channel bias,
    # pad the Cin axis with zeros, and reshape OIHW -> [Cout, 9*Cin] (tap-major,
    # channel-minor) so each conv is a single in-kernel matmul.
    w1 = jnp.pad(p["w1"], ((0, 0), (0, pad), (0, 0), (0, 0)))      # zero in-channels
    w2 = jnp.pad(p["w2"], ((0, pad), (0, 0), (0, 0), (0, 0)))      # zero out-channels
    bn2_scale = jnp.pad(p["bn2_scale"], (0, pad))
    bn2_bias = jnp.pad(p["bn2_bias"], (0, pad))                    # zero bias rows

    w1m = (w1.transpose(0, 2, 3, 1).reshape(Cmid, 9 * Cin_p)
           * p["bn1_scale"][:, None]).astype(jnp.bfloat16)
    w2m = (w2.transpose(0, 2, 3, 1).reshape(Cin_p, 9 * Cmid)
           * bn2_scale[:, None]).astype(jnp.bfloat16)
    b1 = p["bn1_bias"].reshape(Cmid, 1).astype(jnp.float32)
    b2 = bn2_bias.reshape(Cin_p, 1).astype(jnp.float32)
    sws = jnp.stack([jax.nn.sigmoid(p["w_plif1"]),
                     jax.nn.sigmoid(p["w_plif2"])]).astype(jnp.float32)

    # NCHW already has spatial last -> lane-dense [C, H*W] is a free reshape.
    x_flat = x.reshape(T, N, Cin, HW)
    if pad:
        x_flat = jnp.pad(x_flat, ((0, 0), (0, 0), (0, pad), (0, 0)))

    blk = pl.BlockSpec((T, 1, Cin_p, HW), lambda n: (0, n, 0, 0))
    out = pl.pallas_call(
        _make_kernel(T, H, W, Cin_p, Cmid),
        out_shape=jax.ShapeDtypeStruct((T, N, Cin_p, HW), jnp.bfloat16),
        grid=(N,),
        in_specs=[
            pl.BlockSpec(memory_space=pltpu.MemorySpace.SMEM),        # sigmoid(w) x2
            blk,                                                      # x
            pl.BlockSpec((Cmid, 9 * Cin_p), lambda n: (0, 0)),        # w1 (BN folded)
            pl.BlockSpec((Cmid, 1), lambda n: (0, 0)),                # b1
            pl.BlockSpec((Cin_p, 9 * Cmid), lambda n: (0, 0)),        # w2 (BN folded)
            pl.BlockSpec((Cin_p, 1), lambda n: (0, 0)),               # b2
        ],
        out_specs=blk,
        scratch_shapes=[pltpu.VMEM((T, Cmid, HW), jnp.float32)],      # hoisted u1
        compiler_params=pltpu.CompilerParams(
            dimension_semantics=("parallel",),
        ),
    )(sws, x_flat, w1m, b1, w2m, b2)

    # Drop the padded (always-zero) channels and restore f32 (spikes are {0,1},
    # so the bf16 -> f32 cast is exact).
    return out[:, :, :Cin, :].astype(jnp.float32).reshape(T, N, Cin, H, W)


# ------------------------------- parameters -------------------------------
def init_params(key, in_channels, mid_channels):
    k1, k2 = jax.random.split(key)
    # Conv weights in PyTorch OIHW layout, deterministic.
    w1 = jax.random.normal(k1, (mid_channels, in_channels, 3, 3), jnp.float32) * 0.3
    w2 = jax.random.normal(k2, (in_channels, mid_channels, 3, 3), jnp.float32) * 0.3

    # BatchNorm2d at PyTorch init, folded to per-channel affine (inference stats):
    # gamma=1, beta=0, running_mean=0, running_var=1.
    def bn_fold(c):
        gamma = jnp.ones((c,), jnp.float32)
        beta = jnp.zeros((c,), jnp.float32)
        mean = jnp.zeros((c,), jnp.float32)
        var = jnp.ones((c,), jnp.float32)
        scale = gamma / jnp.sqrt(var + BN_EPS)
        return scale, beta - mean * scale

    bn1_scale, bn1_bias = bn_fold(mid_channels)
    bn2_scale, bn2_bias = bn_fold(in_channels)
    # ParametricLIFNode learnable param: w = -log(init_tau - 1); init_tau=2.0 -> w=0.
    w_plif1 = jnp.float32(0.0)
    w_plif2 = jnp.float32(0.0)
    return dict(w1=w1, w2=w2, bn1_scale=bn1_scale, bn1_bias=bn1_bias,
                bn2_scale=bn2_scale, bn2_bias=bn2_bias,
                w_plif1=w_plif1, w_plif2=w_plif2)


if __name__ == "__main__":
    T, N, Cin, Cmid, H, W = 4, 2, 4, 8, 16, 16
    key = jax.random.PRNGKey(0)
    kx, kp = jax.random.split(key)
    x = jax.random.normal(kx, (T, N, Cin, H, W), jnp.float32)
    params = init_params(kp, Cin, Cmid)

    out = jax.jit(basic_block_forward)(x, params)
    jax.block_until_ready(out)
    assert out.shape == (T, N, Cin, H, W) and out.dtype == jnp.float32
    # Output of a spiking block must be exactly binary.
    assert bool(jnp.all((out == 0.0) | (out == 1.0)))
    print("KERNEL_OK")
</pallas_src>

<mosaic_0001>
module attributes {stable_mosaic.version = 11 : i64} {
  func.func @kernel(%arg0: i32, %arg1: memref<2xf32, #tpu.memory_space<smem>>, %arg2: memref<4x1x8x256xf32, #tpu.memory_space<vmem>>, %arg3: memref<8x72xbf16, #tpu.memory_space<vmem>>, %arg4: memref<8x1xf32, #tpu.memory_space<vmem>>, %arg5: memref<8x72xbf16, #tpu.memory_space<vmem>>, %arg6: memref<8x1xf32, #tpu.memory_space<vmem>>, %arg7: memref<4x1x8x256xbf16, #tpu.memory_space<vmem>>, %arg8: memref<4x8x256xf32, #tpu.memory_space<vmem>>) attributes {dimension_semantics = [#tpu.dimension_semantics<parallel>], iteration_bounds = array<i64: 2>, scalar_prefetch = 0 : i64, scratch_operands = 1 : i64, tpu.core_type = #tpu.core_type<tc>, window_params = [{transform_indices = @transform_0, window_bounds = array<i64: 2>}, {transform_indices = @transform_1, window_bounds = array<i64: 4, 1, 8, 256>}, {pipeline_mode = #tpu.pipeline_mode<synchronous>, transform_indices = @transform_2, window_bounds = array<i64: 8, 72>}, {pipeline_mode = #tpu.pipeline_mode<synchronous>, transform_indices = @transform_3, window_bounds = array<i64: 8, 1>}, {pipeline_mode = #tpu.pipeline_mode<synchronous>, transform_indices = @transform_4, window_bounds = array<i64: 8, 72>}, {pipeline_mode = #tpu.pipeline_mode<synchronous>, transform_indices = @transform_5, window_bounds = array<i64: 8, 1>}, {transform_indices = @transform_6, window_bounds = array<i64: 4, 1, 8, 256>}]} {
    %c0 = arith.constant 0 : index
    %0 = memref.load %arg1[%c0] : memref<2xf32, #tpu.memory_space<smem>>
    %c1 = arith.constant 1 : index
    %1 = memref.load %arg1[%c1] : memref<2xf32, #tpu.memory_space<smem>>
    %2 = tpu.iota {dimensions = array<i32: 1>} : vector<1x256xi32>
    %c16_i32 = arith.constant 16 : i32
    %c0_i32 = arith.constant 0 : i32
    %3 = arith.cmpi eq, %c16_i32, %c0_i32 : i32
    %c1_i32 = arith.constant 1 : i32
    %4 = arith.select %3, %c1_i32, %c16_i32 : i32
    %5 = vector.broadcast %4 : i32 to vector<1x256xi32>
    %6 = arith.remsi %2, %5 : vector<1x256xi32>
    %c0_i32_0 = arith.constant 0 : i32
    %7 = vector.broadcast %c0_i32_0 : i32 to vector<1x256xi32>
    %8 = arith.cmpi ne, %6, %7 : vector<1x256xi32>
    %c0_i32_1 = arith.constant 0 : i32
    %9 = vector.broadcast %c0_i32_1 : i32 to vector<1x256xi32>
    %10 = arith.cmpi slt, %6, %9 : vector<1x256xi32>
    %c0_i32_2 = arith.constant 0 : i32
    %11 = arith.cmpi slt, %4, %c0_i32_2 : i32
    %12 = vector.broadcast %11 : i1 to vector<1x256xi1>
    %13 = vector.broadcast %12 : vector<1x256xi1> to vector<1x256xi1>
    %14 = arith.xori %10, %13 : vector<1x256xi1>
    %15 = arith.andi %14, %8 : vector<1x256xi1>
    %16 = vector.broadcast %4 : i32 to vector<1x256xi32>
    %17 = arith.addi %6, %16 : vector<1x256xi32>
    %18 = arith.select %15, %17, %6 : vector<1x256xi1>, vector<1x256xi32>
    %c-17_i32 = arith.constant -17 : i32
    %19 = vector.broadcast %c-17_i32 : i32 to vector<1x256xi32>
    %20 = arith.addi %2, %19 : vector<1x256xi32>
    %c0_i32_3 = arith.constant 0 : i32
    %21 = vector.broadcast %c0_i32_3 : i32 to vector<1x256xi32>
    %22 = arith.cmpi sge, %20, %21 : vector<1x256xi32>
    %c-17_i32_4 = arith.constant -17 : i32
    %23 = vector.broadcast %c-17_i32_4 : i32 to vector<1x256xi32>
    %24 = arith.addi %2, %23 : vector<1x256xi32>
    %c256_i32 = arith.constant 256 : i32
    %25 = vector.broadcast %c256_i32 : i32 to vector<1x256xi32>
    %26 = arith.cmpi slt, %24, %25 : vector<1x256xi32>
    %27 = arith.andi %22, %26 : vector<1x256xi1>
    %c-1_i32 = arith.constant -1 : i32
    %28 = vector.broadcast %c-1_i32 : i32 to vector<1x256xi32>
    %29 = arith.addi %18, %28 : vector<1x256xi32>
    %c0_i32_5 = arith.constant 0 : i32
    %30 = vector.broadcast %c0_i32_5 : i32 to vector<1x256xi32>
    %31 = arith.cmpi sge, %29, %30 : vector<1x256xi32>
    %c-1_i32_6 = arith.constant -1 : i32
    %32 = vector.broadcast %c-1_i32_6 : i32 to vector<1x256xi32>
    %33 = arith.addi %18, %32 : vector<1x256xi32>
    %c15_i32 = arith.constant 15 : i32
    %34 = vector.broadcast %c15_i32 : i32 to vector<1x256xi32>
    %35 = arith.cmpi sle, %33, %34 : vector<1x256xi32>
    %36 = arith.andi %31, %35 : vector<1x256xi1>
    %37 = arith.andi %27, %36 : vector<1x256xi1>
    %38 = arith.extui %37 : vector<1x256xi1> to vector<1x256xi32>
    %39 = arith.sitofp %38 : vector<1x256xi32> to vector<1x256xf32>
    %c-16_i32 = arith.constant -16 : i32
    %40 = vector.broadcast %c-16_i32 : i32 to vector<1x256xi32>
    %41 = arith.addi %2, %40 : vector<1x256xi32>
    %c0_i32_7 = arith.constant 0 : i32
    %42 = vector.broadcast %c0_i32_7 : i32 to vector<1x256xi32>
    %43 = arith.cmpi sge, %41, %42 : vector<1x256xi32>
    %c-16_i32_8 = arith.constant -16 : i32
    %44 = vector.broadcast %c-16_i32_8 : i32 to vector<1x256xi32>
    %45 = arith.addi %2, %44 : vector<1x256xi32>
    %c256_i32_9 = arith.constant 256 : i32
    %46 = vector.broadcast %c256_i32_9 : i32 to vector<1x256xi32>
    %47 = arith.cmpi slt, %45, %46 : vector<1x256xi32>
    %48 = arith.andi %43, %47 : vector<1x256xi1>
    %c0_i32_10 = arith.constant 0 : i32
    %49 = vector.broadcast %c0_i32_10 : i32 to vector<1x256xi32>
    %50 = arith.addi %18, %49 : vector<1x256xi32>
    %c0_i32_11 = arith.constant 0 : i32
    %51 = vector.broadcast %c0_i32_11 : i32 to vector<1x256xi32>
    %52 = arith.cmpi sge, %50, %51 : vector<1x256xi32>
    %c0_i32_12 = arith.constant 0 : i32
    %53 = vector.broadcast %c0_i32_12 : i32 to vector<1x256xi32>
    %54 = arith.addi %18, %53 : vector<1x256xi32>
    %c15_i32_13 = arith.constant 15 : i32
    %55 = vector.broadcast %c15_i32_13 : i32 to vector<1x256xi32>
    %56 = arith.cmpi sle, %54, %55 : vector<1x256xi32>
    %57 = arith.andi %52, %56 : vector<1x256xi1>
    %58 = arith.andi %48, %57 : vector<1x256xi1>
    %59 = arith.extui %58 : vector<1x256xi1> to vector<1x256xi32>
    %60 = arith.sitofp %59 : vector<1x256xi32> to vector<1x256xf32>
    %c-15_i32 = arith.constant -15 : i32
    %61 = vector.broadcast %c-15_i32 : i32 to vector<1x256xi32>
    %62 = arith.addi %2, %61 : vector<1x256xi32>
    %c0_i32_14 = arith.constant 0 : i32
    %63 = vector.broadcast %c0_i32_14 : i32 to vector<1x256xi32>
    %64 = arith.cmpi sge, %62, %63 : vector<1x256xi32>
    %c-15_i32_15 = arith.constant -15 : i32
    %65 = vector.broadcast %c-15_i32_15 : i32 to vector<1x256xi32>
    %66 = arith.addi %2, %65 : vector<1x256xi32>
    %c256_i32_16 = arith.constant 256 : i32
    %67 = vector.broadcast %c256_i32_16 : i32 to vector<1x256xi32>
    %68 = arith.cmpi slt, %66, %67 : vector<1x256xi32>
    %69 = arith.andi %64, %68 : vector<1x256xi1>
    %c1_i32_17 = arith.constant 1 : i32
    %70 = vector.broadcast %c1_i32_17 : i32 to vector<1x256xi32>
    %71 = arith.addi %18, %70 : vector<1x256xi32>
    %c0_i32_18 = arith.constant 0 : i32
    %72 = vector.broadcast %c0_i32_18 : i32 to vector<1x256xi32>
    %73 = arith.cmpi sge, %71, %72 : vector<1x256xi32>
    %c1_i32_19 = arith.constant 1 : i32
    %74 = vector.broadcast %c1_i32_19 : i32 to vector<1x256xi32>
    %75 = arith.addi %18, %74 : vector<1x256xi32>
    %c15_i32_20 = arith.constant 15 : i32
    %76 = vector.broadcast %c15_i32_20 : i32 to vector<1x256xi32>
    %77 = arith.cmpi sle, %75, %76 : vector<1x256xi32>
    %78 = arith.andi %73, %77 : vector<1x256xi1>
    %79 = arith.andi %69, %78 : vector<1x256xi1>
    %80 = arith.extui %79 : vector<1x256xi1> to vector<1x256xi32>
    %81 = arith.sitofp %80 : vector<1x256xi32> to vector<1x256xf32>
    %c-1_i32_21 = arith.constant -1 : i32
    %82 = vector.broadcast %c-1_i32_21 : i32 to vector<1x256xi32>
    %83 = arith.addi %2, %82 : vector<1x256xi32>
    %c0_i32_22 = arith.constant 0 : i32
    %84 = vector.broadcast %c0_i32_22 : i32 to vector<1x256xi32>
    %85 = arith.cmpi sge, %83, %84 : vector<1x256xi32>
    %c-1_i32_23 = arith.constant -1 : i32
    %86 = vector.broadcast %c-1_i32_23 : i32 to vector<1x256xi32>
    %87 = arith.addi %2, %86 : vector<1x256xi32>
    %c256_i32_24 = arith.constant 256 : i32
    %88 = vector.broadcast %c256_i32_24 : i32 to vector<1x256xi32>
    %89 = arith.cmpi slt, %87, %88 : vector<1x256xi32>
    %90 = arith.andi %85, %89 : vector<1x256xi1>
    %c-1_i32_25 = arith.constant -1 : i32
    %91 = vector.broadcast %c-1_i32_25 : i32 to vector<1x256xi32>
    %92 = arith.addi %18, %91 : vector<1x256xi32>
    %c0_i32_26 = arith.constant 0 : i32
    %93 = vector.broadcast %c0_i32_26 : i32 to vector<1x256xi32>
    %94 = arith.cmpi sge, %92, %93 : vector<1x256xi32>
    %c-1_i32_27 = arith.constant -1 : i32
    %95 = vector.broadcast %c-1_i32_27 : i32 to vector<1x256xi32>
    %96 = arith.addi %18, %95 : vector<1x256xi32>
    %c15_i32_28 = arith.constant 15 : i32
    %97 = vector.broadcast %c15_i32_28 : i32 to vector<1x256xi32>
    %98 = arith.cmpi sle, %96, %97 : vector<1x256xi32>
    %99 = arith.andi %94, %98 : vector<1x256xi1>
    %100 = arith.andi %90, %99 : vector<1x256xi1>
    %101 = arith.extui %100 : vector<1x256xi1> to vector<1x256xi32>
    %102 = arith.sitofp %101 : vector<1x256xi32> to vector<1x256xf32>
    %c1_i32_29 = arith.constant 1 : i32
    %103 = vector.broadcast %c1_i32_29 : i32 to vector<1x256xi32>
    %104 = arith.addi %2, %103 : vector<1x256xi32>
    %c0_i32_30 = arith.constant 0 : i32
    %105 = vector.broadcast %c0_i32_30 : i32 to vector<1x256xi32>
    %106 = arith.cmpi sge, %104, %105 : vector<1x256xi32>
    %c1_i32_31 = arith.constant 1 : i32
    %107 = vector.broadcast %c1_i32_31 : i32 to vector<1x256xi32>
    %108 = arith.addi %2, %107 : vector<1x256xi32>
    %c256_i32_32 = arith.constant 256 : i32
    %109 = vector.broadcast %c256_i32_32 : i32 to vector<1x256xi32>
    %110 = arith.cmpi slt, %108, %109 : vector<1x256xi32>
    %111 = arith.andi %106, %110 : vector<1x256xi1>
    %c1_i32_33 = arith.constant 1 : i32
    %112 = vector.broadcast %c1_i32_33 : i32 to vector<1x256xi32>
    %113 = arith.addi %18, %112 : vector<1x256xi32>
    %c0_i32_34 = arith.constant 0 : i32
    %114 = vector.broadcast %c0_i32_34 : i32 to vector<1x256xi32>
    %115 = arith.cmpi sge, %113, %114 : vector<1x256xi32>
    %c1_i32_35 = arith.constant 1 : i32
    %116 = vector.broadcast %c1_i32_35 : i32 to vector<1x256xi32>
    %117 = arith.addi %18, %116 : vector<1x256xi32>
    %c15_i32_36 = arith.constant 15 : i32
    %118 = vector.broadcast %c15_i32_36 : i32 to vector<1x256xi32>
    %119 = arith.cmpi sle, %117, %118 : vector<1x256xi32>
    %120 = arith.andi %115, %119 : vector<1x256xi1>
    %121 = arith.andi %111, %120 : vector<1x256xi1>
    %122 = arith.extui %121 : vector<1x256xi1> to vector<1x256xi32>
    %123 = arith.sitofp %122 : vector<1x256xi32> to vector<1x256xf32>
    %c15_i32_37 = arith.constant 15 : i32
    %124 = vector.broadcast %c15_i32_37 : i32 to vector<1x256xi32>
    %125 = arith.addi %2, %124 : vector<1x256xi32>
    %c0_i32_38 = arith.constant 0 : i32
    %126 = vector.broadcast %c0_i32_38 : i32 to vector<1x256xi32>
    %127 = arith.cmpi sge, %125, %126 : vector<1x256xi32>
    %c15_i32_39 = arith.constant 15 : i32
    %128 = vector.broadcast %c15_i32_39 : i32 to vector<1x256xi32>
    %129 = arith.addi %2, %128 : vector<1x256xi32>
    %c256_i32_40 = arith.constant 256 : i32
    %130 = vector.broadcast %c256_i32_40 : i32 to vector<1x256xi32>
    %131 = arith.cmpi slt, %129, %130 : vector<1x256xi32>
    %132 = arith.andi %127, %131 : vector<1x256xi1>
    %c-1_i32_41 = arith.constant -1 : i32
    %133 = vector.broadcast %c-1_i32_41 : i32 to vector<1x256xi32>
    %134 = arith.addi %18, %133 : vector<1x256xi32>
    %c0_i32_42 = arith.constant 0 : i32
    %135 = vector.broadcast %c0_i32_42 : i32 to vector<1x256xi32>
    %136 = arith.cmpi sge, %134, %135 : vector<1x256xi32>
    %c-1_i32_43 = arith.constant -1 : i32
    %137 = vector.broadcast %c-1_i32_43 : i32 to vector<1x256xi32>
    %138 = arith.addi %18, %137 : vector<1x256xi32>
    %c15_i32_44 = arith.constant 15 : i32
    %139 = vector.broadcast %c15_i32_44 : i32 to vector<1x256xi32>
    %140 = arith.cmpi sle, %138, %139 : vector<1x256xi32>
    %141 = arith.andi %136, %140 : vector<1x256xi1>
    %142 = arith.andi %132, %141 : vector<1x256xi1>
    %143 = arith.extui %142 : vector<1x256xi1> to vector<1x256xi32>
    %144 = arith.sitofp %143 : vector<1x256xi32> to vector<1x256xf32>
    %c16_i32_45 = arith.constant 16 : i32
    %145 = vector.broadcast %c16_i32_45 : i32 to vector<1x256xi32>
    %146 = arith.addi %2, %145 : vector<1x256xi32>
    %c0_i32_46 = arith.constant 0 : i32
    %147 = vector.broadcast %c0_i32_46 : i32 to vector<1x256xi32>
    %148 = arith.cmpi sge, %146, %147 : vector<1x256xi32>
    %c16_i32_47 = arith.constant 16 : i32
    %149 = vector.broadcast %c16_i32_47 : i32 to vector<1x256xi32>
    %150 = arith.addi %2, %149 : vector<1x256xi32>
    %c256_i32_48 = arith.constant 256 : i32
    %151 = vector.broadcast %c256_i32_48 : i32 to vector<1x256xi32>
    %152 = arith.cmpi slt, %150, %151 : vector<1x256xi32>
    %153 = arith.andi %148, %152 : vector<1x256xi1>
    %c0_i32_49 = arith.constant 0 : i32
    %154 = vector.broadcast %c0_i32_49 : i32 to vector<1x256xi32>
    %155 = arith.addi %18, %154 : vector<1x256xi32>
    %c0_i32_50 = arith.constant 0 : i32
    %156 = vector.broadcast %c0_i32_50 : i32 to vector<1x256xi32>
    %157 = arith.cmpi sge, %155, %156 : vector<1x256xi32>
    %c0_i32_51 = arith.constant 0 : i32
    %158 = vector.broadcast %c0_i32_51 : i32 to vector<1x256xi32>
    %159 = arith.addi %18, %158 : vector<1x256xi32>
    %c15_i32_52 = arith.constant 15 : i32
    %160 = vector.broadcast %c15_i32_52 : i32 to vector<1x256xi32>
    %161 = arith.cmpi sle, %159, %160 : vector<1x256xi32>
    %162 = arith.andi %157, %161 : vector<1x256xi1>
    %163 = arith.andi %153, %162 : vector<1x256xi1>
    %164 = arith.extui %163 : vector<1x256xi1> to vector<1x256xi32>
    %165 = arith.sitofp %164 : vector<1x256xi32> to vector<1x256xf32>
    %c17_i32 = arith.constant 17 : i32
    %166 = vector.broadcast %c17_i32 : i32 to vector<1x256xi32>
    %167 = arith.addi %2, %166 : vector<1x256xi32>
    %c0_i32_53 = arith.constant 0 : i32
    %168 = vector.broadcast %c0_i32_53 : i32 to vector<1x256xi32>
    %169 = arith.cmpi sge, %167, %168 : vector<1x256xi32>
    %c17_i32_54 = arith.constant 17 : i32
    %170 = vector.broadcast %c17_i32_54 : i32 to vector<1x256xi32>
    %171 = arith.addi %2, %170 : vector<1x256xi32>
    %c256_i32_55 = arith.constant 256 : i32
    %172 = vector.broadcast %c256_i32_55 : i32 to vector<1x256xi32>
    %173 = arith.cmpi slt, %171, %172 : vector<1x256xi32>
    %174 = arith.andi %169, %173 : vector<1x256xi1>
    %c1_i32_56 = arith.constant 1 : i32
    %175 = vector.broadcast %c1_i32_56 : i32 to vector<1x256xi32>
    %176 = arith.addi %18, %175 : vector<1x256xi32>
    %c0_i32_57 = arith.constant 0 : i32
    %177 = vector.broadcast %c0_i32_57 : i32 to vector<1x256xi32>
    %178 = arith.cmpi sge, %176, %177 : vector<1x256xi32>
    %c1_i32_58 = arith.constant 1 : i32
    %179 = vector.broadcast %c1_i32_58 : i32 to vector<1x256xi32>
    %180 = arith.addi %18, %179 : vector<1x256xi32>
    %c15_i32_59 = arith.constant 15 : i32
    %181 = vector.broadcast %c15_i32_59 : i32 to vector<1x256xi32>
    %182 = arith.cmpi sle, %180, %181 : vector<1x256xi32>
    %183 = arith.andi %178, %182 : vector<1x256xi1>
    %184 = arith.andi %174, %183 : vector<1x256xi1>
    %185 = arith.extui %184 : vector<1x256xi1> to vector<1x256xi32>
    %186 = arith.sitofp %185 : vector<1x256xi32> to vector<1x256xf32>
    %c0_60 = arith.constant 0 : index
    %c0_61 = arith.constant 0 : index
    %187 = vector.load %arg3[%c0_60, %c0_61] : memref<8x72xbf16, #tpu.memory_space<vmem>>, vector<8x72xbf16>
    %c0_62 = arith.constant 0 : index
    %c0_63 = arith.constant 0 : index
    %188 = vector.load %arg5[%c0_62, %c0_63] : memref<8x72xbf16, #tpu.memory_space<vmem>>, vector<8x72xbf16>
    %c0_64 = arith.constant 0 : index
    %c0_65 = arith.constant 0 : index
    %189 = vector.load %arg6[%c0_64, %c0_65] : memref<8x1xf32, #tpu.memory_space<vmem>>, vector<8x1xf32>
    %190 = vector.shape_cast %189 : vector<8x1xf32> to vector<8x1xf32>
    %191 = vector.broadcast %190 : vector<8x1xf32> to vector<8x256xf32>
    %c0_66 = arith.constant 0 : index
    %c0_67 = arith.constant 0 : index
    %c0_68 = arith.constant 0 : index
    %c0_69 = arith.constant 0 : index
    %192 = vector.load %arg2[%c0_66, %c0_67, %c0_68, %c0_69] : memref<4x1x8x256xf32, #tpu.memory_space<vmem>>, vector<1x1x8x256xf32>
    %193 = vector.shape_cast %192 : vector<1x1x8x256xf32> to vector<8x256xf32>
    %c17_i32_70 = arith.constant 17 : i32
    %194 = tpu.dynamic_rotate %193 by %c17_i32_70 dim 1 : vector<8x256xf32>, i32 -> vector<8x256xf32>
    %195 = vector.broadcast %39 : vector<1x256xf32> to vector<8x256xf32>
    %196 = arith.mulf %194, %195 : vector<8x256xf32>
    %c16_i32_71 = arith.constant 16 : i32
    %197 = tpu.dynamic_rotate %193 by %c16_i32_71 dim 1 : vector<8x256xf32>, i32 -> vector<8x256xf32>
    %198 = vector.broadcast %60 : vector<1x256xf32> to vector<8x256xf32>
    %199 = arith.mulf %197, %198 : vector<8x256xf32>
    %c15_i32_72 = arith.constant 15 : i32
    %200 = tpu.dynamic_rotate %193 by %c15_i32_72 dim 1 : vector<8x256xf32>, i32 -> vector<8x256xf32>
    %201 = vector.broadcast %81 : vector<1x256xf32> to vector<8x256xf32>
    %202 = arith.mulf %200, %201 : vector<8x256xf32>
    %c1_i32_73 = arith.constant 1 : i32
    %203 = tpu.dynamic_rotate %193 by %c1_i32_73 dim 1 : vector<8x256xf32>, i32 -> vector<8x256xf32>
    %204 = vector.broadcast %102 : vector<1x256xf32> to vector<8x256xf32>
    %205 = arith.mulf %203, %204 : vector<8x256xf32>
    %c255_i32 = arith.constant 255 : i32
    %206 = tpu.dynamic_rotate %193 by %c255_i32 dim 1 : vector<8x256xf32>, i32 -> vector<8x256xf32>
    %207 = vector.broadcast %123 : vector<1x256xf32> to vector<8x256xf32>
    %208 = arith.mulf %206, %207 : vector<8x256xf32>
    %c241_i32 = arith.constant 241 : i32
    %209 = tpu.dynamic_rotate %193 by %c241_i32 dim 1 : vector<8x256xf32>, i32 -> vector<8x256xf32>
    %210 = vector.broadcast %144 : vector<1x256xf32> to vector<8x256xf32>
    %211 = arith.mulf %209, %210 : vector<8x256xf32>
    %c240_i32 = arith.constant 240 : i32
    %212 = tpu.dynamic_rotate %193 by %c240_i32 dim 1 : vector<8x256xf32>, i32 -> vector<8x256xf32>
    %213 = vector.broadcast %165 : vector<1x256xf32> to vector<8x256xf32>
    %214 = arith.mulf %212, %213 : vector<8x256xf32>
    %c239_i32 = arith.constant 239 : i32
    %215 = tpu.dynamic_rotate %193 by %c239_i32 dim 1 : vector<8x256xf32>, i32 -> vector<8x256xf32>
    %216 = vector.broadcast %186 : vector<1x256xf32> to vector<8x256xf32>
    %217 = arith.mulf %215, %216 : vector<8x256xf32>
    %218 = tpu.concatenate %196, %199, %202, %205, %193, %208, %211, %214, %217 in 0 : vector<8x256xf32>, vector<8x256xf32>, vector<8x256xf32>, vector<8x256xf32>, vector<8x256xf32>, vector<8x256xf32>, vector<8x256xf32>, vector<8x256xf32>, vector<8x256xf32> -> vector<72x256xf32>
    %219 = arith.truncf %218 : vector<72x256xf32> to vector<72x256xbf16>
    %c1_74 = arith.constant 1 : index
    %c0_75 = arith.constant 0 : index
    %c0_76 = arith.constant 0 : index
    %c0_77 = arith.constant 0 : index
    %220 = vector.load %arg2[%c1_74, %c0_75, %c0_76, %c0_77] : memref<4x1x8x256xf32, #tpu.memory_space<vmem>>, vector<1x1x8x256xf32>
    %221 = vector.shape_cast %220 : vector<1x1x8x256xf32> to vector<8x256xf32>
    %c17_i32_78 = arith.constant 17 : i32
    %222 = tpu.dynamic_rotate %221 by %c17_i32_78 dim 1 : vector<8x256xf32>, i32 -> vector<8x256xf32>
    %223 = vector.broadcast %39 : vector<1x256xf32> to vector<8x256xf32>
    %224 = arith.mulf %222, %223 : vector<8x256xf32>
    %c16_i32_79 = arith.constant 16 : i32
    %225 = tpu.dynamic_rotate %221 by %c16_i32_79 dim 1 : vector<8x256xf32>, i32 -> vector<8x256xf32>
    %226 = vector.broadcast %60 : vector<1x256xf32> to vector<8x256xf32>
    %227 = arith.mulf %225, %226 : vector<8x256xf32>
    %c15_i32_80 = arith.constant 15 : i32
    %228 = tpu.dynamic_rotate %221 by %c15_i32_80 dim 1 : vector<8x256xf32>, i32 -> vector<8x256xf32>
    %229 = vector.broadcast %81 : vector<1x256xf32> to vector<8x256xf32>
    %230 = arith.mulf %228, %229 : vector<8x256xf32>
    %c1_i32_81 = arith.constant 1 : i32
    %231 = tpu.dynamic_rotate %221 by %c1_i32_81 dim 1 : vector<8x256xf32>, i32 -> vector<8x256xf32>
    %232 = vector.broadcast %102 : vector<1x256xf32> to vector<8x256xf32>
    %233 = arith.mulf %231, %232 : vector<8x256xf32>
    %c255_i32_82 = arith.constant 255 : i32
    %234 = tpu.dynamic_rotate %221 by %c255_i32_82 dim 1 : vector<8x256xf32>, i32 -> vector<8x256xf32>
    %235 = vector.broadcast %123 : vector<1x256xf32> to vector<8x256xf32>
    %236 = arith.mulf %234, %235 : vector<8x256xf32>
    %c241_i32_83 = arith.constant 241 : i32
    %237 = tpu.dynamic_rotate %221 by %c241_i32_83 dim 1 : vector<8x256xf32>, i32 -> vector<8x256xf32>
    %238 = vector.broadcast %144 : vector<1x256xf32> to vector<8x256xf32>
    %239 = arith.mulf %237, %238 : vector<8x256xf32>
    %c240_i32_84 = arith.constant 240 : i32
    %240 = tpu.dynamic_rotate %221 by %c240_i32_84 dim 1 : vector<8x256xf32>, i32 -> vector<8x256xf32>
    %241 = vector.broadcast %165 : vector<1x256xf32> to vector<8x256xf32>
    %242 = arith.mulf %240, %241 : vector<8x256xf32>
    %c239_i32_85 = arith.constant 239 : i32
    %243 = tpu.dynamic_rotate %221 by %c239_i32_85 dim 1 : vector<8x256xf32>, i32 -> vector<8x256xf32>
    %244 = vector.broadcast %186 : vector<1x256xf32> to vector<8x256xf32>
    %245 = arith.mulf %243, %244 : vector<8x256xf32>
    %246 = tpu.concatenate %224, %227, %230, %233, %221, %236, %239, %242, %245 in 0 : vector<8x256xf32>, vector<8x256xf32>, vector<8x256xf32>, vector<8x256xf32>, vector<8x256xf32>, vector<8x256xf32>, vector<8x256xf32>, vector<8x256xf32>, vector<8x256xf32> -> vector<72x256xf32>
    %247 = arith.truncf %246 : vector<72x256xf32> to vector<72x256xbf16>
    %c2 = arith.constant 2 : index
    %c0_86 = arith.constant 0 : index
    %c0_87 = arith.constant 0 : index
    %c0_88 = arith.constant 0 : index
    %248 = vector.load %arg2[%c2, %c0_86, %c0_87, %c0_88] : memref<4x1x8x256xf32, #tpu.memory_space<vmem>>, vector<1x1x8x256xf32>
    %249 = vector.shape_cast %248 : vector<1x1x8x256xf32> to vector<8x256xf32>
    %c17_i32_89 = arith.constant 17 : i32
    %250 = tpu.dynamic_rotate %249 by %c17_i32_89 dim 1 : vector<8x256xf32>, i32 -> vector<8x256xf32>
    %251 = vector.broadcast %39 : vector<1x256xf32> to vector<8x256xf32>
    %252 = arith.mulf %250, %251 : vector<8x256xf32>
    %c16_i32_90 = arith.constant 16 : i32
    %253 = tpu.dynamic_rotate %249 by %c16_i32_90 dim 1 : vector<8x256xf32>, i32 -> vector<8x256xf32>
    %254 = vector.broadcast %60 : vector<1x256xf32> to vector<8x256xf32>
    %255 = arith.mulf %253, %254 : vector<8x256xf32>
    %c15_i32_91 = arith.constant 15 : i32
    %256 = tpu.dynamic_rotate %249 by %c15_i32_91 dim 1 : vector<8x256xf32>, i32 -> vector<8x256xf32>
    %257 = vector.broadcast %81 : vector<1x256xf32> to vector<8x256xf32>
    %258 = arith.mulf %256, %257 : vector<8x256xf32>
    %c1_i32_92 = arith.constant 1 : i32
    %259 = tpu.dynamic_rotate %249 by %c1_i32_92 dim 1 : vector<8x256xf32>, i32 -> vector<8x256xf32>
    %260 = vector.broadcast %102 : vector<1x256xf32> to vector<8x256xf32>
    %261 = arith.mulf %259, %260 : vector<8x256xf32>
    %c255_i32_93 = arith.constant 255 : i32
    %262 = tpu.dynamic_rotate %249 by %c255_i32_93 dim 1 : vector<8x256xf32>, i32 -> vector<8x256xf32>
    %263 = vector.broadcast %123 : vector<1x256xf32> to vector<8x256xf32>
    %264 = arith.mulf %262, %263 : vector<8x256xf32>
    %c241_i32_94 = arith.constant 241 : i32
    %265 = tpu.dynamic_rotate %249 by %c241_i32_94 dim 1 : vector<8x256xf32>, i32 -> vector<8x256xf32>
    %266 = vector.broadcast %144 : vector<1x256xf32> to vector<8x256xf32>
    %267 = arith.mulf %265, %266 : vector<8x256xf32>
    %c240_i32_95 = arith.constant 240 : i32
    %268 = tpu.dynamic_rotate %249 by %c240_i32_95 dim 1 : vector<8x256xf32>, i32 -> vector<8x256xf32>
    %269 = vector.broadcast %165 : vector<1x256xf32> to vector<8x256xf32>
    %270 = arith.mulf %268, %269 : vector<8x256xf32>
    %c239_i32_96 = arith.constant 239 : i32
    %271 = tpu.dynamic_rotate %249 by %c239_i32_96 dim 1 : vector<8x256xf32>, i32 -> vector<8x256xf32>
    %272 = vector.broadcast %186 : vector<1x256xf32> to vector<8x256xf32>
    %273 = arith.mulf %271, %272 : vector<8x256xf32>
    %274 = tpu.concatenate %252, %255, %258, %261, %249, %264, %267, %270, %273 in 0 : vector<8x256xf32>, vector<8x256xf32>, vector<8x256xf32>, vector<8x256xf32>, vector<8x256xf32>, vector<8x256xf32>, vector<8x256xf32>, vector<8x256xf32>, vector<8x256xf32> -> vector<72x256xf32>
    %275 = arith.truncf %274 : vector<72x256xf32> to vector<72x256xbf16>
    %c3 = arith.constant 3 : index
    %c0_97 = arith.constant 0 : index
    %c0_98 = arith.constant 0 : index
    %c0_99 = arith.constant 0 : index
    %276 = vector.load %arg2[%c3, %c0_97, %c0_98, %c0_99] : memref<4x1x8x256xf32, #tpu.memory_space<vmem>>, vector<1x1x8x256xf32>
    %277 = vector.shape_cast %276 : vector<1x1x8x256xf32> to vector<8x256xf32>
    %c17_i32_100 = arith.constant 17 : i32
    %278 = tpu.dynamic_rotate %277 by %c17_i32_100 dim 1 : vector<8x256xf32>, i32 -> vector<8x256xf32>
    %279 = vector.broadcast %39 : vector<1x256xf32> to vector<8x256xf32>
    %280 = arith.mulf %278, %279 : vector<8x256xf32>
    %c16_i32_101 = arith.constant 16 : i32
    %281 = tpu.dynamic_rotate %277 by %c16_i32_101 dim 1 : vector<8x256xf32>, i32 -> vector<8x256xf32>
    %282 = vector.broadcast %60 : vector<1x256xf32> to vector<8x256xf32>
    %283 = arith.mulf %281, %282 : vector<8x256xf32>
    %c15_i32_102 = arith.constant 15 : i32
    %284 = tpu.dynamic_rotate %277 by %c15_i32_102 dim 1 : vector<8x256xf32>, i32 -> vector<8x256xf32>
    %285 = vector.broadcast %81 : vector<1x256xf32> to vector<8x256xf32>
    %286 = arith.mulf %284, %285 : vector<8x256xf32>
    %c1_i32_103 = arith.constant 1 : i32
    %287 = tpu.dynamic_rotate %277 by %c1_i32_103 dim 1 : vector<8x256xf32>, i32 -> vector<8x256xf32>
    %288 = vector.broadcast %102 : vector<1x256xf32> to vector<8x256xf32>
    %289 = arith.mulf %287, %288 : vector<8x256xf32>
    %c255_i32_104 = arith.constant 255 : i32
    %290 = tpu.dynamic_rotate %277 by %c255_i32_104 dim 1 : vector<8x256xf32>, i32 -> vector<8x256xf32>
    %291 = vector.broadcast %123 : vector<1x256xf32> to vector<8x256xf32>
    %292 = arith.mulf %290, %291 : vector<8x256xf32>
    %c241_i32_105 = arith.constant 241 : i32
    %293 = tpu.dynamic_rotate %277 by %c241_i32_105 dim 1 : vector<8x256xf32>, i32 -> vector<8x256xf32>
    %294 = vector.broadcast %144 : vector<1x256xf32> to vector<8x256xf32>
    %295 = arith.mulf %293, %294 : vector<8x256xf32>
    %c240_i32_106 = arith.constant 240 : i32
    %296 = tpu.dynamic_rotate %277 by %c240_i32_106 dim 1 : vector<8x256xf32>, i32 -> vector<8x256xf32>
    %297 = vector.broadcast %165 : vector<1x256xf32> to vector<8x256xf32>
    %298 = arith.mulf %296, %297 : vector<8x256xf32>
    %c239_i32_107 = arith.constant 239 : i32
    %299 = tpu.dynamic_rotate %277 by %c239_i32_107 dim 1 : vector<8x256xf32>, i32 -> vector<8x256xf32>
    %300 = vector.broadcast %186 : vector<1x256xf32> to vector<8x256xf32>
    %301 = arith.mulf %299, %300 : vector<8x256xf32>
    %302 = tpu.concatenate %280, %283, %286, %289, %277, %292, %295, %298, %301 in 0 : vector<8x256xf32>, vector<8x256xf32>, vector<8x256xf32>, vector<8x256xf32>, vector<8x256xf32>, vector<8x256xf32>, vector<8x256xf32>, vector<8x256xf32>, vector<8x256xf32> -> vector<72x256xf32>
    %303 = arith.truncf %302 : vector<72x256xf32> to vector<72x256xbf16>
    %304 = tpu.concatenate %219, %247, %275, %303 in 1 : vector<72x256xbf16>, vector<72x256xbf16>, vector<72x256xbf16>, vector<72x256xbf16> -> vector<72x1024xbf16>
    %cst = arith.constant dense<0.000000e+00> : vector<8x1024xf32>
    %305 = tpu.matmul %187, %304, %cst {dimension_numbers = #tpu.dot_dimension_numbers<[1], [0], [0], [1], [0, 0, 1, 1], [], []>} : vector<8x72xbf16>, vector<72x1024xbf16>, vector<8x1024xf32> -> vector<8x1024xf32>
    %c0_108 = arith.constant 0 : index
    %c0_109 = arith.constant 0 : index
    %306 = vector.load %arg4[%c0_108, %c0_109] : memref<8x1xf32, #tpu.memory_space<vmem>>, vector<8x1xf32>
    %307 = vector.broadcast %306 : vector<8x1xf32> to vector<8x1024xf32>
    %308 = arith.addf %305, %307 : vector<8x1024xf32>
    %309 = vector.extract_strided_slice %308 {offsets = [0, 0], sizes = [8, 256], strides = [1, 1]} : vector<8x1024xf32> to vector<8x256xf32>
    %c0_110 = arith.constant 0 : index
    %c0_111 = arith.constant 0 : index
    %c0_112 = arith.constant 0 : index
    %310 = vector.load %arg8[%c0_110, %c0_111, %c0_112] : memref<4x8x256xf32, #tpu.memory_space<vmem>>, vector<1x8x256xf32>
    %311 = vector.shape_cast %310 : vector<1x8x256xf32> to vector<8x256xf32>
    %312 = vector.shape_cast %309 : vector<8x256xf32> to vector<1x8x256xf32>
    tpu.vector_store %arg8[%c0_110, %c0_111, %c0_112], %312 {strides = array<i32>} : memref<4x8x256xf32, #tpu.memory_space<vmem>>, vector<1x8x256xf32>,
    %313 = vector.extract_strided_slice %308 {offsets = [0, 256], sizes = [8, 256], strides = [1, 1]} : vector<8x1024xf32> to vector<8x256xf32>
    %c1_113 = arith.constant 1 : index
    %c0_114 = arith.constant 0 : index
    %c0_115 = arith.constant 0 : index
    %314 = vector.load %arg8[%c1_113, %c0_114, %c0_115] : memref<4x8x256xf32, #tpu.memory_space<vmem>>, vector<1x8x256xf32>
    %315 = vector.shape_cast %314 : vector<1x8x256xf32> to vector<8x256xf32>
    %316 = vector.shape_cast %313 : vector<8x256xf32> to vector<1x8x256xf32>
    tpu.vector_store %arg8[%c1_113, %c0_114, %c0_115], %316 {strides = array<i32>} : memref<4x8x256xf32, #tpu.memory_space<vmem>>, vector<1x8x256xf32>,
    %317 = vector.extract_strided_slice %308 {offsets = [0, 512], sizes = [8, 256], strides = [1, 1]} : vector<8x1024xf32> to vector<8x256xf32>
    %c2_116 = arith.constant 2 : index
    %c0_117 = arith.constant 0 : index
    %c0_118 = arith.constant 0 : index
    %318 = vector.load %arg8[%c2_116, %c0_117, %c0_118] : memref<4x8x256xf32, #tpu.memory_space<vmem>>, vector<1x8x256xf32>
    %319 = vector.shape_cast %318 : vector<1x8x256xf32> to vector<8x256xf32>
    %320 = vector.shape_cast %317 : vector<8x256xf32> to vector<1x8x256xf32>
    tpu.vector_store %arg8[%c2_116, %c0_117, %c0_118], %320 {strides = array<i32>} : memref<4x8x256xf32, #tpu.memory_space<vmem>>, vector<1x8x256xf32>,
    %321 = vector.extract_strided_slice %308 {offsets = [0, 768], sizes = [8, 256], strides = [1, 1]} : vector<8x1024xf32> to vector<8x256xf32>
    %c3_119 = arith.constant 3 : index
    %c0_120 = arith.constant 0 : index
    %c0_121 = arith.constant 0 : index
    %322 = vector.load %arg8[%c3_119, %c0_120, %c0_121] : memref<4x8x256xf32, #tpu.memory_space<vmem>>, vector<1x8x256xf32>
    %323 = vector.shape_cast %322 : vector<1x8x256xf32> to vector<8x256xf32>
    %324 = vector.shape_cast %321 : vector<8x256xf32> to vector<1x8x256xf32>
    tpu.vector_store %arg8[%c3_119, %c0_120, %c0_121], %324 {strides = array<i32>} : memref<4x8x256xf32, #tpu.memory_space<vmem>>, vector<1x8x256xf32>,
    %cst_122 = arith.constant 0.000000e+00 : f32
    %325 = vector.broadcast %cst_122 : f32 to vector<8x256xf32>
    %cst_123 = arith.constant 0.000000e+00 : f32
    %326 = vector.broadcast %cst_123 : f32 to vector<8x256xf32>
    %c0_i32_124 = arith.constant 0 : i32
    %327 = arith.index_cast %c0_i32_124 : i32 to index
    %c0_125 = arith.constant 0 : index
    %c0_126 = arith.constant 0 : index
    %328 = vector.load %arg8[%327, %c0_125, %c0_126] : memref<4x8x256xf32, #tpu.memory_space<vmem>>, vector<1x8x256xf32>
    %329 = vector.shape_cast %328 : vector<1x8x256xf32> to vector<8x256xf32>
    %330 = arith.subf %329, %325 : vector<8x256xf32>
    %331 = vector.broadcast %0 : f32 to vector<8x256xf32>
    %332 = arith.mulf %330, %331 : vector<8x256xf32>
    %333 = arith.addf %325, %332 : vector<8x256xf32>
    %cst_127 = arith.constant 1.000000e+00 : f32
    %334 = vector.broadcast %cst_127 : f32 to vector<8x256xf32>
    %335 = arith.cmpf oge, %333, %334 : vector<8x256xf32>
    %336 = arith.extui %335 : vector<8x256xi1> to vector<8x256xi32>
    %337 = arith.sitofp %336 : vector<8x256xi32> to vector<8x256xf32>
    %cst_128 = arith.constant 1.000000e+00 : f32
    %338 = vector.broadcast %cst_128 : f32 to vector<8x256xf32>
    %339 = arith.subf %338, %337 : vector<8x256xf32>
    %340 = arith.mulf %333, %339 : vector<8x256xf32>
    %c17_i32_129 = arith.constant 17 : i32
    %341 = tpu.dynamic_rotate %337 by %c17_i32_129 dim 1 : vector<8x256xf32>, i32 -> vector<8x256xf32>
    %342 = vector.broadcast %39 : vector<1x256xf32> to vector<8x256xf32>
    %343 = arith.mulf %341, %342 : vector<8x256xf32>
    %c16_i32_130 = arith.constant 16 : i32
    %344 = tpu.dynamic_rotate %337 by %c16_i32_130 dim 1 : vector<8x256xf32>, i32 -> vector<8x256xf32>
    %345 = vector.broadcast %60 : vector<1x256xf32> to vector<8x256xf32>
    %346 = arith.mulf %344, %345 : vector<8x256xf32>
    %c15_i32_131 = arith.constant 15 : i32
    %347 = tpu.dynamic_rotate %337 by %c15_i32_131 dim 1 : vector<8x256xf32>, i32 -> vector<8x256xf32>
    %348 = vector.broadcast %81 : vector<1x256xf32> to vector<8x256xf32>
    %349 = arith.mulf %347, %348 : vector<8x256xf32>
    %c1_i32_132 = arith.constant 1 : i32
    %350 = tpu.dynamic_rotate %337 by %c1_i32_132 dim 1 : vector<8x256xf32>, i32 -> vector<8x256xf32>
    %351 = vector.broadcast %102 : vector<1x256xf32> to vector<8x256xf32>
    %352 = arith.mulf %350, %351 : vector<8x256xf32>
    %c255_i32_133 = arith.constant 255 : i32
    %353 = tpu.dynamic_rotate %337 by %c255_i32_133 dim 1 : vector<8x256xf32>, i32 -> vector<8x256xf32>
    %354 = vector.broadcast %123 : vector<1x256xf32> to vector<8x256xf32>
    %355 = arith.mulf %353, %354 : vector<8x256xf32>
    %c241_i32_134 = arith.constant 241 : i32
    %356 = tpu.dynamic_rotate %337 by %c241_i32_134 dim 1 : vector<8x256xf32>, i32 -> vector<8x256xf32>
    %357 = vector.broadcast %144 : vector<1x256xf32> to vector<8x256xf32>
    %358 = arith.mulf %356, %357 : vector<8x256xf32>
    %c240_i32_135 = arith.constant 240 : i32
    %359 = tpu.dynamic_rotate %337 by %c240_i32_135 dim 1 : vector<8x256xf32>, i32 -> vector<8x256xf32>
    %360 = vector.broadcast %165 : vector<1x256xf32> to vector<8x256xf32>
    %361 = arith.mulf %359, %360 : vector<8x256xf32>
    %c239_i32_136 = arith.constant 239 : i32
    %362 = tpu.dynamic_rotate %337 by %c239_i32_136 dim 1 : vector<8x256xf32>, i32 -> vector<8x256xf32>
    %363 = vector.broadcast %186 : vector<1x256xf32> to vector<8x256xf32>
    %364 = arith.mulf %362, %363 : vector<8x256xf32>
    %365 = tpu.concatenate %343, %346, %349, %352, %337, %355, %358, %361, %364 in 0 : vector<8x256xf32>, vector<8x256xf32>, vector<8x256xf32>, vector<8x256xf32>, vector<8x256xf32>, vector<8x256xf32>, vector<8x256xf32>, vector<8x256xf32>, vector<8x256xf32> -> vector<72x256xf32>
    %366 = arith.truncf %365 : vector<72x256xf32> to vector<72x256xbf16>
    %cst_137 = arith.constant dense<0.000000e+00> : vector<8x256xf32>
    %367 = tpu.matmul %188, %366, %cst_137 {dimension_numbers = #tpu.dot_dimension_numbers<[1], [0], [0], [1], [0, 0, 1, 1], [], []>} : vector<8x72xbf16>, vector<72x256xbf16>, vector<8x256xf32> -> vector<8x256xf32>
    %368 = arith.addf %367, %191 : vector<8x256xf32>
    %369 = arith.index_cast %c0_i32_124 : i32 to index
    %c0_138 = arith.constant 0 : index
    %c0_139 = arith.constant 0 : index
    %c0_140 = arith.constant 0 : index
    %370 = vector.load %arg2[%369, %c0_138, %c0_139, %c0_140] : memref<4x1x8x256xf32, #tpu.memory_space<vmem>>, vector<1x1x8x256xf32>
    %371 = vector.shape_cast %370 : vector<1x1x8x256xf32> to vector<8x256xf32>
    %372 = arith.addf %371, %368 : vector<8x256xf32>
    %373 = arith.subf %372, %326 : vector<8x256xf32>
    %374 = vector.broadcast %1 : f32 to vector<8x256xf32>
    %375 = arith.mulf %373, %374 : vector<8x256xf32>
    %376 = arith.addf %326, %375 : vector<8x256xf32>
    %cst_141 = arith.constant 1.000000e+00 : f32
    %377 = vector.broadcast %cst_141 : f32 to vector<8x256xf32>
    %378 = arith.cmpf oge, %376, %377 : vector<8x256xf32>
    %379 = arith.extui %378 : vector<8x256xi1> to vector<8x256xi32>
    %380 = arith.sitofp %379 : vector<8x256xi32> to vector<8x256xf32>
    %cst_142 = arith.constant 1.000000e+00 : f32
    %381 = vector.broadcast %cst_142 : f32 to vector<8x256xf32>
    %382 = arith.subf %381, %380 : vector<8x256xf32>
    %383 = arith.mulf %376, %382 : vector<8x256xf32>
    %384 = arith.truncf %380 : vector<8x256xf32> to vector<8x256xbf16>
    %385 = arith.index_cast %c0_i32_124 : i32 to index
    %c0_143 = arith.constant 0 : index
    %c0_144 = arith.constant 0 : index
    %c0_145 = arith.constant 0 : index
    %386 = vector.load %arg7[%385, %c0_143, %c0_144, %c0_145] : memref<4x1x8x256xbf16, #tpu.memory_space<vmem>>, vector<1x1x8x256xbf16>
    %387 = vector.shape_cast %386 : vector<1x1x8x256xbf16> to vector<8x256xbf16>
    %388 = vector.shape_cast %384 : vector<8x256xbf16> to vector<1x1x8x256xbf16>
    tpu.vector_store %arg7[%385, %c0_143, %c0_144, %c0_145], %388 {strides = array<i32>} : memref<4x1x8x256xbf16, #tpu.memory_space<vmem>>, vector<1x1x8x256xbf16>,
    %c1_i32_146 = arith.constant 1 : i32
    %389 = arith.index_cast %c1_i32_146 : i32 to index
    %c0_147 = arith.constant 0 : index
    %c0_148 = arith.constant 0 : index
    %390 = vector.load %arg8[%389, %c0_147, %c0_148] : memref<4x8x256xf32, #tpu.memory_space<vmem>>, vector<1x8x256xf32>
    %391 = vector.shape_cast %390 : vector<1x8x256xf32> to vector<8x256xf32>
    %392 = arith.subf %391, %340 : vector<8x256xf32>
    %393 = vector.broadcast %0 : f32 to vector<8x256xf32>
    %394 = arith.mulf %392, %393 : vector<8x256xf32>
    %395 = arith.addf %340, %394 : vector<8x256xf32>
    %cst_149 = arith.constant 1.000000e+00 : f32
    %396 = vector.broadcast %cst_149 : f32 to vector<8x256xf32>
    %397 = arith.cmpf oge, %395, %396 : vector<8x256xf32>
    %398 = arith.extui %397 : vector<8x256xi1> to vector<8x256xi32>
    %399 = arith.sitofp %398 : vector<8x256xi32> to vector<8x256xf32>
    %cst_150 = arith.constant 1.000000e+00 : f32
    %400 = vector.broadcast %cst_150 : f32 to vector<8x256xf32>
    %401 = arith.subf %400, %399 : vector<8x256xf32>
    %402 = arith.mulf %395, %401 : vector<8x256xf32>
    %c17_i32_151 = arith.constant 17 : i32
    %403 = tpu.dynamic_rotate %399 by %c17_i32_151 dim 1 : vector<8x256xf32>, i32 -> vector<8x256xf32>
    %404 = vector.broadcast %39 : vector<1x256xf32> to vector<8x256xf32>
    %405 = arith.mulf %403, %404 : vector<8x256xf32>
    %c16_i32_152 = arith.constant 16 : i32
    %406 = tpu.dynamic_rotate %399 by %c16_i32_152 dim 1 : vector<8x256xf32>, i32 -> vector<8x256xf32>
    %407 = vector.broadcast %60 : vector<1x256xf32> to vector<8x256xf32>
    %408 = arith.mulf %406, %407 : vector<8x256xf32>
    %c15_i32_153 = arith.constant 15 : i32
    %409 = tpu.dynamic_rotate %399 by %c15_i32_153 dim 1 : vector<8x256xf32>, i32 -> vector<8x256xf32>
    %410 = vector.broadcast %81 : vector<1x256xf32> to vector<8x256xf32>
    %411 = arith.mulf %409, %410 : vector<8x256xf32>
    %c1_i32_154 = arith.constant 1 : i32
    %412 = tpu.dynamic_rotate %399 by %c1_i32_154 dim 1 : vector<8x256xf32>, i32 -> vector<8x256xf32>
    %413 = vector.broadcast %102 : vector<1x256xf32> to vector<8x256xf32>
    %414 = arith.mulf %412, %413 : vector<8x256xf32>
    %c255_i32_155 = arith.constant 255 : i32
    %415 = tpu.dynamic_rotate %399 by %c255_i32_155 dim 1 : vector<8x256xf32>, i32 -> vector<8x256xf32>
    %416 = vector.broadcast %123 : vector<1x256xf32> to vector<8x256xf32>
    %417 = arith.mulf %415, %416 : vector<8x256xf32>
    %c241_i32_156 = arith.constant 241 : i32
    %418 = tpu.dynamic_rotate %399 by %c241_i32_156 dim 1 : vector<8x256xf32>, i32 -> vector<8x256xf32>
    %419 = vector.broadcast %144 : vector<1x256xf32> to vector<8x256xf32>
    %420 = arith.mulf %418, %419 : vector<8x256xf32>
    %c240_i32_157 = arith.constant 240 : i32
    %421 = tpu.dynamic_rotate %399 by %c240_i32_157 dim 1 : vector<8x256xf32>, i32 -> vector<8x256xf32>
    %422 = vector.broadcast %165 : vector<1x256xf32> to vector<8x256xf32>
    %423 = arith.mulf %421, %422 : vector<8x256xf32>
    %c239_i32_158 = arith.constant 239 : i32
    %424 = tpu.dynamic_rotate %399 by %c239_i32_158 dim 1 : vector<8x256xf32>, i32 -> vector<8x256xf32>
    %425 = vector.broadcast %186 : vector<1x256xf32> to vector<8x256xf32>
    %426 = arith.mulf %424, %425 : vector<8x256xf32>
    %427 = tpu.concatenate %405, %408, %411, %414, %399, %417, %420, %423, %426 in 0 : vector<8x256xf32>, vector<8x256xf32>, vector<8x256xf32>, vector<8x256xf32>, vector<8x256xf32>, vector<8x256xf32>, vector<8x256xf32>, vector<8x256xf32>, vector<8x256xf32> -> vector<72x256xf32>
    %428 = arith.truncf %427 : vector<72x256xf32> to vector<72x256xbf16>
    %cst_159 = arith.constant dense<0.000000e+00> : vector<8x256xf32>
    %429 = tpu.matmul %188, %428, %cst_159 {dimension_numbers = #tpu.dot_dimension_numbers<[1], [0], [0], [1], [0, 0, 1, 1], [], []>} : vector<8x72xbf16>, vector<72x256xbf16>, vector<8x256xf32> -> vector<8x256xf32>
    %430 = arith.addf %429, %191 : vector<8x256xf32>
    %431 = arith.index_cast %c1_i32_146 : i32 to index
    %c0_160 = arith.constant 0 : index
    %c0_161 = arith.constant 0 : index
    %c0_162 = arith.constant 0 : index
    %432 = vector.load %arg2[%431, %c0_160, %c0_161, %c0_162] : memref<4x1x8x256xf32, #tpu.memory_space<vmem>>, vector<1x1x8x256xf32>
    %433 = vector.shape_cast %432 : vector<1x1x8x256xf32> to vector<8x256xf32>
    %434 = arith.addf %433, %430 : vector<8x256xf32>
    %435 = arith.subf %434, %383 : vector<8x256xf32>
    %436 = vector.broadcast %1 : f32 to vector<8x256xf32>
    %437 = arith.mulf %435, %436 : vector<8x256xf32>
    %438 = arith.addf %383, %437 : vector<8x256xf32>
    %cst_163 = arith.constant 1.000000e+00 : f32
    %439 = vector.broadcast %cst_163 : f32 to vector<8x256xf32>
    %440 = arith.cmpf oge, %438, %439 : vector<8x256xf32>
    %441 = arith.extui %440 : vector<8x256xi1> to vector<8x256xi32>
    %442 = arith.sitofp %441 : vector<8x256xi32> to vector<8x256xf32>
    %cst_164 = arith.constant 1.000000e+00 : f32
    %443 = vector.broadcast %cst_164 : f32 to vector<8x256xf32>
    %444 = arith.subf %443, %442 : vector<8x256xf32>
    %445 = arith.mulf %438, %444 : vector<8x256xf32>
    %446 = arith.truncf %442 : vector<8x256xf32> to vector<8x256xbf16>
    %447 = arith.index_cast %c1_i32_146 : i32 to index
    %c0_165 = arith.constant 0 : index
    %c0_166 = arith.constant 0 : index
    %c0_167 = arith.constant 0 : index
    %448 = vector.load %arg7[%447, %c0_165, %c0_166, %c0_167] : memref<4x1x8x256xbf16, #tpu.memory_space<vmem>>, vector<1x1x8x256xbf16>
    %449 = vector.shape_cast %448 : vector<1x1x8x256xbf16> to vector<8x256xbf16>
    %450 = vector.shape_cast %446 : vector<8x256xbf16> to vector<1x1x8x256xbf16>
    tpu.vector_store %arg7[%447, %c0_165, %c0_166, %c0_167], %450 {strides = array<i32>} : memref<4x1x8x256xbf16, #tpu.memory_space<vmem>>, vector<1x1x8x256xbf16>,
    %c2_i32 = arith.constant 2 : i32
    %451 = arith.index_cast %c2_i32 : i32 to index
    %c0_168 = arith.constant 0 : index
    %c0_169 = arith.constant 0 : index
    %452 = vector.load %arg8[%451, %c0_168, %c0_169] : memref<4x8x256xf32, #tpu.memory_space<vmem>>, vector<1x8x256xf32>
    %453 = vector.shape_cast %452 : vector<1x8x256xf32> to vector<8x256xf32>
    %454 = arith.subf %453, %402 : vector<8x256xf32>
    %455 = vector.broadcast %0 : f32 to vector<8x256xf32>
    %456 = arith.mulf %454, %455 : vector<8x256xf32>
    %457 = arith.addf %402, %456 : vector<8x256xf32>
    %cst_170 = arith.constant 1.000000e+00 : f32
    %458 = vector.broadcast %cst_170 : f32 to vector<8x256xf32>
    %459 = arith.cmpf oge, %457, %458 : vector<8x256xf32>
    %460 = arith.extui %459 : vector<8x256xi1> to vector<8x256xi32>
    %461 = arith.sitofp %460 : vector<8x256xi32> to vector<8x256xf32>
    %cst_171 = arith.constant 1.000000e+00 : f32
    %462 = vector.broadcast %cst_171 : f32 to vector<8x256xf32>
    %463 = arith.subf %462, %461 : vector<8x256xf32>
    %464 = arith.mulf %457, %463 : vector<8x256xf32>
    %c17_i32_172 = arith.constant 17 : i32
    %465 = tpu.dynamic_rotate %461 by %c17_i32_172 dim 1 : vector<8x256xf32>, i32 -> vector<8x256xf32>
    %466 = vector.broadcast %39 : vector<1x256xf32> to vector<8x256xf32>
    %467 = arith.mulf %465, %466 : vector<8x256xf32>
    %c16_i32_173 = arith.constant 16 : i32
    %468 = tpu.dynamic_rotate %461 by %c16_i32_173 dim 1 : vector<8x256xf32>, i32 -> vector<8x256xf32>
    %469 = vector.broadcast %60 : vector<1x256xf32> to vector<8x256xf32>
    %470 = arith.mulf %468, %469 : vector<8x256xf32>
    %c15_i32_174 = arith.constant 15 : i32
    %471 = tpu.dynamic_rotate %461 by %c15_i32_174 dim 1 : vector<8x256xf32>, i32 -> vector<8x256xf32>
    %472 = vector.broadcast %81 : vector<1x256xf32> to vector<8x256xf32>
    %473 = arith.mulf %471, %472 : vector<8x256xf32>
    %c1_i32_175 = arith.constant 1 : i32
    %474 = tpu.dynamic_rotate %461 by %c1_i32_175 dim 1 : vector<8x256xf32>, i32 -> vector<8x256xf32>
    %475 = vector.broadcast %102 : vector<1x256xf32> to vector<8x256xf32>
    %476 = arith.mulf %474, %475 : vector<8x256xf32>
    %c255_i32_176 = arith.constant 255 : i32
    %477 = tpu.dynamic_rotate %461 by %c255_i32_176 dim 1 : vector<8x256xf32>, i32 -> vector<8x256xf32>
    %478 = vector.broadcast %123 : vector<1x256xf32> to vector<8x256xf32>
    %479 = arith.mulf %477, %478 : vector<8x256xf32>
    %c241_i32_177 = arith.constant 241 : i32
    %480 = tpu.dynamic_rotate %461 by %c241_i32_177 dim 1 : vector<8x256xf32>, i32 -> vector<8x256xf32>
    %481 = vector.broadcast %144 : vector<1x256xf32> to vector<8x256xf32>
    %482 = arith.mulf %480, %481 : vector<8x256xf32>
    %c240_i32_178 = arith.constant 240 : i32
    %483 = tpu.dynamic_rotate %461 by %c240_i32_178 dim 1 : vector<8x256xf32>, i32 -> vector<8x256xf32>
    %484 = vector.broadcast %165 : vector<1x256xf32> to vector<8x256xf32>
    %485 = arith.mulf %483, %484 : vector<8x256xf32>
    %c239_i32_179 = arith.constant 239 : i32
    %486 = tpu.dynamic_rotate %461 by %c239_i32_179 dim 1 : vector<8x256xf32>, i32 -> vector<8x256xf32>
    %487 = vector.broadcast %186 : vector<1x256xf32> to vector<8x256xf32>
    %488 = arith.mulf %486, %487 : vector<8x256xf32>
    %489 = tpu.concatenate %467, %470, %473, %476, %461, %479, %482, %485, %488 in 0 : vector<8x256xf32>, vector<8x256xf32>, vector<8x256xf32>, vector<8x256xf32>, vector<8x256xf32>, vector<8x256xf32>, vector<8x256xf32>, vector<8x256xf32>, vector<8x256xf32> -> vector<72x256xf32>
    %490 = arith.truncf %489 : vector<72x256xf32> to vector<72x256xbf16>
    %cst_180 = arith.constant dense<0.000000e+00> : vector<8x256xf32>
    %491 = tpu.matmul %188, %490, %cst_180 {dimension_numbers = #tpu.dot_dimension_numbers<[1], [0], [0], [1], [0, 0, 1, 1], [], []>} : vector<8x72xbf16>, vector<72x256xbf16>, vector<8x256xf32> -> vector<8x256xf32>
    %492 = arith.addf %491, %191 : vector<8x256xf32>
    %493 = arith.index_cast %c2_i32 : i32 to index
    %c0_181 = arith.constant 0 : index
    %c0_182 = arith.constant 0 : index
    %c0_183 = arith.constant 0 : index
    %494 = vector.load %arg2[%493, %c0_181, %c0_182, %c0_183] : memref<4x1x8x256xf32, #tpu.memory_space<vmem>>, vector<1x1x8x256xf32>
    %495 = vector.shape_cast %494 : vector<1x1x8x256xf32> to vector<8x256xf32>
    %496 = arith.addf %495, %492 : vector<8x256xf32>
    %497 = arith.subf %496, %445 : vector<8x256xf32>
    %498 = vector.broadcast %1 : f32 to vector<8x256xf32>
    %499 = arith.mulf %497, %498 : vector<8x256xf32>
    %500 = arith.addf %445, %499 : vector<8x256xf32>
    %cst_184 = arith.constant 1.000000e+00 : f32
    %501 = vector.broadcast %cst_184 : f32 to vector<8x256xf32>
    %502 = arith.cmpf oge, %500, %501 : vector<8x256xf32>
    %503 = arith.extui %502 : vector<8x256xi1> to vector<8x256xi32>
    %504 = arith.sitofp %503 : vector<8x256xi32> to vector<8x256xf32>
    %cst_185 = arith.constant 1.000000e+00 : f32
    %505 = vector.broadcast %cst_185 : f32 to vector<8x256xf32>
    %506 = arith.subf %505, %504 : vector<8x256xf32>
    %507 = arith.mulf %500, %506 : vector<8x256xf32>
    %508 = arith.truncf %504 : vector<8x256xf32> to vector<8x256xbf16>
    %509 = arith.index_cast %c2_i32 : i32 to index
    %c0_186 = arith.constant 0 : index
    %c0_187 = arith.constant 0 : index
    %c0_188 = arith.constant 0 : index
    %510 = vector.load %arg7[%509, %c0_186, %c0_187, %c0_188] : memref<4x1x8x256xbf16, #tpu.memory_space<vmem>>, vector<1x1x8x256xbf16>
    %511 = vector.shape_cast %510 : vector<1x1x8x256xbf16> to vector<8x256xbf16>
    %512 = vector.shape_cast %508 : vector<8x256xbf16> to vector<1x1x8x256xbf16>
    tpu.vector_store %arg7[%509, %c0_186, %c0_187, %c0_188], %512 {strides = array<i32>} : memref<4x1x8x256xbf16, #tpu.memory_space<vmem>>, vector<1x1x8x256xbf16>,
    %c3_i32 = arith.constant 3 : i32
    %513 = arith.index_cast %c3_i32 : i32 to index
    %c0_189 = arith.constant 0 : index
    %c0_190 = arith.constant 0 : index
    %514 = vector.load %arg8[%513, %c0_189, %c0_190] : memref<4x8x256xf32, #tpu.memory_space<vmem>>, vector<1x8x256xf32>
    %515 = vector.shape_cast %514 : vector<1x8x256xf32> to vector<8x256xf32>
    %516 = arith.subf %515, %464 : vector<8x256xf32>
    %517 = vector.broadcast %0 : f32 to vector<8x256xf32>
    %518 = arith.mulf %516, %517 : vector<8x256xf32>
    %519 = arith.addf %464, %518 : vector<8x256xf32>
    %cst_191 = arith.constant 1.000000e+00 : f32
    %520 = vector.broadcast %cst_191 : f32 to vector<8x256xf32>
    %521 = arith.cmpf oge, %519, %520 : vector<8x256xf32>
    %522 = arith.extui %521 : vector<8x256xi1> to vector<8x256xi32>
    %523 = arith.sitofp %522 : vector<8x256xi32> to vector<8x256xf32>
    %cst_192 = arith.constant 1.000000e+00 : f32
    %524 = vector.broadcast %cst_192 : f32 to vector<8x256xf32>
    %525 = arith.subf %524, %523 : vector<8x256xf32>
    %526 = arith.mulf %519, %525 : vector<8x256xf32>
    %c17_i32_193 = arith.constant 17 : i32
    %527 = tpu.dynamic_rotate %523 by %c17_i32_193 dim 1 : vector<8x256xf32>, i32 -> vector<8x256xf32>
    %528 = vector.broadcast %39 : vector<1x256xf32> to vector<8x256xf32>
    %529 = arith.mulf %527, %528 : vector<8x256xf32>
    %c16_i32_194 = arith.constant 16 : i32
    %530 = tpu.dynamic_rotate %523 by %c16_i32_194 dim 1 : vector<8x256xf32>, i32 -> vector<8x256xf32>
    %531 = vector.broadcast %60 : vector<1x256xf32> to vector<8x256xf32>
    %532 = arith.mulf %530, %531 : vector<8x256xf32>
    %c15_i32_195 = arith.constant 15 : i32
    %533 = tpu.dynamic_rotate %523 by %c15_i32_195 dim 1 : vector<8x256xf32>, i32 -> vector<8x256xf32>
    %534 = vector.broadcast %81 : vector<1x256xf32> to vector<8x256xf32>
    %535 = arith.mulf %533, %534 : vector<8x256xf32>
    %c1_i32_196 = arith.constant 1 : i32
    %536 = tpu.dynamic_rotate %523 by %c1_i32_196 dim 1 : vector<8x256xf32>, i32 -> vector<8x256xf32>
    %537 = vector.broadcast %102 : vector<1x256xf32> to vector<8x256xf32>
    %538 = arith.mulf %536, %537 : vector<8x256xf32>
    %c255_i32_197 = arith.constant 255 : i32
    %539 = tpu.dynamic_rotate %523 by %c255_i32_197 dim 1 : vector<8x256xf32>, i32 -> vector<8x256xf32>
    %540 = vector.broadcast %123 : vector<1x256xf32> to vector<8x256xf32>
    %541 = arith.mulf %539, %540 : vector<8x256xf32>
    %c241_i32_198 = arith.constant 241 : i32
    %542 = tpu.dynamic_rotate %523 by %c241_i32_198 dim 1 : vector<8x256xf32>, i32 -> vector<8x256xf32>
    %543 = vector.broadcast %144 : vector<1x256xf32> to vector<8x256xf32>
    %544 = arith.mulf %542, %543 : vector<8x256xf32>
    %c240_i32_199 = arith.constant 240 : i32
    %545 = tpu.dynamic_rotate %523 by %c240_i32_199 dim 1 : vector<8x256xf32>, i32 -> vector<8x256xf32>
    %546 = vector.broadcast %165 : vector<1x256xf32> to vector<8x256xf32>
    %547 = arith.mulf %545, %546 : vector<8x256xf32>
    %c239_i32_200 = arith.constant 239 : i32
    %548 = tpu.dynamic_rotate %523 by %c239_i32_200 dim 1 : vector<8x256xf32>, i32 -> vector<8x256xf32>
    %549 = vector.broadcast %186 : vector<1x256xf32> to vector<8x256xf32>
    %550 = arith.mulf %548, %549 : vector<8x256xf32>
    %551 = tpu.concatenate %529, %532, %535, %538, %523, %541, %544, %547, %550 in 0 : vector<8x256xf32>, vector<8x256xf32>, vector<8x256xf32>, vector<8x256xf32>, vector<8x256xf32>, vector<8x256xf32>, vector<8x256xf32>, vector<8x256xf32>, vector<8x256xf32> -> vector<72x256xf32>
    %552 = arith.truncf %551 : vector<72x256xf32> to vector<72x256xbf16>
    %cst_201 = arith.constant dense<0.000000e+00> : vector<8x256xf32>
    %553 = tpu.matmul %188, %552, %cst_201 {dimension_numbers = #tpu.dot_dimension_numbers<[1], [0], [0], [1], [0, 0, 1, 1], [], []>} : vector<8x72xbf16>, vector<72x256xbf16>, vector<8x256xf32> -> vector<8x256xf32>
    %554 = arith.addf %553, %191 : vector<8x256xf32>
    %555 = arith.index_cast %c3_i32 : i32 to index
    %c0_202 = arith.constant 0 : index
    %c0_203 = arith.constant 0 : index
    %c0_204 = arith.constant 0 : index
    %556 = vector.load %arg2[%555, %c0_202, %c0_203, %c0_204] : memref<4x1x8x256xf32, #tpu.memory_space<vmem>>, vector<1x1x8x256xf32>
    %557 = vector.shape_cast %556 : vector<1x1x8x256xf32> to vector<8x256xf32>
    %558 = arith.addf %557, %554 : vector<8x256xf32>
    %559 = arith.subf %558, %507 : vector<8x256xf32>
    %560 = vector.broadcast %1 : f32 to vector<8x256xf32>
    %561 = arith.mulf %559, %560 : vector<8x256xf32>
    %562 = arith.addf %507, %561 : vector<8x256xf32>
    %cst_205 = arith.constant 1.000000e+00 : f32
    %563 = vector.broadcast %cst_205 : f32 to vector<8x256xf32>
    %564 = arith.cmpf oge, %562, %563 : vector<8x256xf32>
    %565 = arith.extui %564 : vector<8x256xi1> to vector<8x256xi32>
    %566 = arith.sitofp %565 : vector<8x256xi32> to vector<8x256xf32>
    %cst_206 = arith.constant 1.000000e+00 : f32
    %567 = vector.broadcast %cst_206 : f32 to vector<8x256xf32>
    %568 = arith.subf %567, %566 : vector<8x256xf32>
    %569 = arith.mulf %562, %568 : vector<8x256xf32>
    %570 = arith.truncf %566 : vector<8x256xf32> to vector<8x256xbf16>
    %571 = arith.index_cast %c3_i32 : i32 to index
    %c0_207 = arith.constant 0 : index
    %c0_208 = arith.constant 0 : index
    %c0_209 = arith.constant 0 : index
    %572 = vector.load %arg7[%571, %c0_207, %c0_208, %c0_209] : memref<4x1x8x256xbf16, #tpu.memory_space<vmem>>, vector<1x1x8x256xbf16>
    %573 = vector.shape_cast %572 : vector<1x1x8x256xbf16> to vector<8x256xbf16>
    %574 = vector.shape_cast %570 : vector<8x256xbf16> to vector<1x1x8x256xbf16>
    tpu.vector_store %arg7[%571, %c0_207, %c0_208, %c0_209], %574 {strides = array<i32>} : memref<4x1x8x256xbf16, #tpu.memory_space<vmem>>, vector<1x1x8x256xbf16>,
    %c4_i32 = arith.constant 4 : i32
    return
  }
  func.func @transform_0(%arg0: i32) -> i32 {
    %c0_i32 = arith.constant 0 : i32
    %c0_i32_0 = arith.constant 0 : i32
    return %c0_i32 : i32
  }
  func.func @transform_1(%arg0: i32) -> (i32, i32, i32, i32) {
    %c0_i32 = arith.constant 0 : i32
    %c0_i32_0 = arith.constant 0 : i32
    %c0_i32_1 = arith.constant 0 : i32
    %c0_i32_2 = arith.constant 0 : i32
    return %c0_i32, %arg0, %c0_i32_0, %c0_i32_1 : i32, i32, i32, i32
  }
  func.func @transform_2(%arg0: i32) -> (i32, i32) {
    %c0_i32 = arith.constant 0 : i32
    %c0_i32_0 = arith.constant 0 : i32
    %c0_i32_1 = arith.constant 0 : i32
    return %c0_i32, %c0_i32_0 : i32, i32
  }
  func.func @transform_3(%arg0: i32) -> (i32, i32) {
    %c0_i32 = arith.constant 0 : i32
    %c0_i32_0 = arith.constant 0 : i32
    %c0_i32_1 = arith.constant 0 : i32
    return %c0_i32, %c0_i32_0 : i32, i32
  }
  func.func @transform_4(%arg0: i32) -> (i32, i32) {
    %c0_i32 = arith.constant 0 : i32
    %c0_i32_0 = arith.constant 0 : i32
    %c0_i32_1 = arith.constant 0 : i32
    return %c0_i32, %c0_i32_0 : i32, i32
  }
  func.func @transform_5(%arg0: i32) -> (i32, i32) {
    %c0_i32 = arith.constant 0 : i32
    %c0_i32_0 = arith.constant 0 : i32
    %c0_i32_1 = arith.constant 0 : i32
    return %c0_i32, %c0_i32_0 : i32, i32
  }
  func.func @transform_6(%arg0: i32) -> (i32, i32, i32, i32) {
    %c0_i32 = arith.constant 0 : i32
    %c0_i32_0 = arith.constant 0 : i32
    %c0_i32_1 = arith.constant 0 : i32
    %c0_i32_2 = arith.constant 0 : i32
    return %c0_i32, %arg0, %c0_i32_0, %c0_i32_1 : i32, i32, i32, i32
  }
}

</mosaic_0001>

<bundles_post_ra>
// kernel: basic_block_forward.1
= control target key start
LH: loop header
LB: loop body
LE: loop exit
PB: predicated region body
PF: predicated region fallthrough
CT: control target
= control target key end

     0   :  { %11 = vsyncpa [#allocation4], 0  ;;  %s2193_s21 = smov 0   ;;  %s2195_s22 = smov 0   ;;  %s3138_s0 = inlined_call_operand.vmem [shape: f32[2], index: 0, kind: input, shape index: {}]   ;;  %s3139_s1 = inlined_call_operand.vmem [shape: f32[4,2,8,256], index: 1, kind: input, shape index: {}]   ;;  %s3140_s2 = inlined_call_operand.vmem [shape: bf16[8,72], index: 2, kind: input, shape index: {}]   ;;  %s3141_s3 = inlined_call_operand.vmem [shape: f32[8,1], index: 3, kind: input, shape index: {}]   ;;  %s3142_s4 = inlined_call_operand.vmem [shape: bf16[8,72], index: 4, kind: input, shape index: {}]   ;;  %s3143_s5 = inlined_call_operand.vmem [shape: f32[8,1], index: 5, kind: input, shape index: {}]   ;;  %s3144_s6 = inlined_call_operand.vmem [shape: bf16[4,2,8,256], index: 6, kind: output, shape index: {}]  }
   0x1   :  { %s2197_s23 = smov 0  }
   0x2 LB: > { %s2209_s24 = sadd.s32 4294967295, %s2143_s23   ;;  %s2212_s25 = sadd.s32 1, %s2143_s23   ;;  %s2143_s23 = sphi %s2197_s23, %s3161_s23   ;;  %s2139_s22 = sphi %s2195_s22, %s3160_s22   ;;  %s2135_s21 = sphi %s2193_s21, %s3159_s21  }
   0x3   : > { %s42_s26 = ssub.s32 %s2143_s23, %s2212_s25  ;;  %s45_s27 = sadd.s32 1, %s2139_s22 }
   0x4   : > { %p43_p0 = scmp.eq.s32.totalorder %s42_s26, 0  ;;  %p52_p1 = scmp.ne.s32.totalorder %s2139_s22, %s2135_s21 }
   0x5   : > { %p53_p2 = scmp.eq.s32.totalorder %s2143_s23, 0  ;;  %p166_p3 = scmp.eq.s32.totalorder %s2209_s24, 1 }
   0x6   : > { %s2222_s28 = scalar_select %p43_p0, %s2139_s22, %s45_s27  }
   0x7   : > { %p2224_p4 = por %p53_p2, %p52_p1  ;;  %p2228_p5 = por %p166_p3, %p52_p1 }
   0x8   : > { %p1783_p6 = scmp.ge.s32.totalorder %s2143_s23, 1  ;;  %p179_p7 = scmp.lt.s32.totalorder %s2143_s23, 3 }
   0x9   : > { %s3151_s30 = scalar_select %p2228_p5, 1, 0 }
   0xa   : > { %p1902_p8 = scmp.eq.s32.totalorder %s2209_s24, 0  ;;  %p2235_p9 = pnand %p1783_p6, %p179_p7 }
   0xb   : > { %s192_s10 = sshll.u32 %s3138_s0, 4  ;;  %s193_s10 = int_to_ptr.vmem [resolvable:$true] %s192_s10 }
   0xc   : > { %p1898_p10 = pneg %p2235_p9  ;;  %s2102_s11 = scalar_lea.vmem %s193_s10, 16 }
   0xd   : > { %p2103_p12 = scmp.ne.s32.totalorder %s193_s10, %s2102_s11  ;;  %p2110_p2 = scmp.lt.s32.totalorder %s193_s10, %s193_s10 }
   0xe   : > { %p1899_p11 = pnand %p1902_p8, %p1898_p10  ;;  %p2111_p3 = scmp.lt.s32.totalorder %s2102_s11, %s2102_s11 }
  0x10   : > { %p2104_p13 = pneg %p1899_p11  ;;  %p2112_p6 = por %p2111_p3, %p2110_p2 }
  0x12   : > { %p2105_p0 = pnand %p2104_p13, %p2103_p12 }
  0x14   : > { %p2106_p1 = pneg %p2105_p0 }
  0x16   : > { %p2113_p7 = pnand %p2112_p6, %p2106_p1 }
  0x18   : > { %2116 = shalt.err (!%p2113_p7)
}
  0x19   : > { %s2145_s12 = smov [#allocation3]   ;;  %p1785_p5 = scmp.ge.s32.totalorder %s2143_s23, 2 }
  0x1a   : > { %1901 = dma.vmem_to_smem (!%p1899_p11), %s193_s10, 16, %s2145_s12, [#allocation4]  }
  0x1b   : > { %211 = sbr.rel (%p1785_p5) target bundleno = 42 (0x2a), region = 36 }
  0x22   : > { %214 = sbr.rel (!%p2224_p4) target bundleno = 42 (0x2a), region = 40  ;;  %s216_s13 = sand.u32 (%p2224_p4), 1, %s2139_s22  }
  0x23   : > { %s1888_s14 = sshll.u32 (%p2224_p4), %s2143_s23, 4  ;;  %s1786_s15 = sshll.u32 (%p2224_p4), %s216_s13, 6 }
  0x24   : > { %s221_s18 = scalar_lea.vmem (%p2224_p4), %s3139_s1, %s1888_s14  ;;  %s218_s19 = scalar_lea.vmem (%p2224_p4), [#allocation5], %s1786_s15 }
  0x25   : > { %v234_v0 = vld [vmem:[%s221_s18] sm:$0xff] (%p2224_p4)  ;;  %v236_v1 = vld [vmem:[%s221_s18 + $0x8] sm:$0xff] (%p2224_p4) }
  0x26   : > { %v238_v2 = vld [vmem:[%s221_s18 + $0x20] sm:$0xff] (%p2224_p4)  ;;  %235 = vst [vmem:[%s218_s19] sm:$0xff] (%p2224_p4), %v234_v0  ;;  %237 = vst [vmem:[%s218_s19 + $0x8] sm:$0xff] (%p2224_p4), %v236_v1  ;;  %v240_v3 = vld [vmem:[%s221_s18 + $0x28] sm:$0xff] (%p2224_p4) }
  0x27   : > { %239 = vst [vmem:[%s218_s19 + $0x10] sm:$0xff] (%p2224_p4), %v238_v2  ;;  %v242_v4 = vld [vmem:[%s221_s18 + $0x40] sm:$0xff] (%p2224_p4)  ;;  %v244_v5 = vld [vmem:[%s221_s18 + $0x48] sm:$0xff] (%p2224_p4)  ;;  %241 = vst [vmem:[%s218_s19 + $0x18] sm:$0xff] (%p2224_p4), %v240_v3 }
  0x28   : > { %243 = vst [vmem:[%s218_s19 + $0x20] sm:$0xff] (%p2224_p4), %v242_v4  ;;  %245 = vst [vmem:[%s218_s19 + $0x28] sm:$0xff] (%p2224_p4), %v244_v5  ;;  %v246_v6 = vld [vmem:[%s221_s18 + $0x60] sm:$0xff] (%p2224_p4)  ;;  %v248_v7 = vld [vmem:[%s221_s18 + $0x68] sm:$0xff] (%p2224_p4) }
  0x29   : > { %247 = vst [vmem:[%s218_s19 + $0x30] sm:$0xff] %v246_v6  ;;  %249 = vst [vmem:[%s218_s19 + $0x38] sm:$0xff] %v248_v7 }
  0x2a PF: > { %258 = sbr.rel (%p2235_p9) target bundleno = 906 (0x38a), region = 63 }
  0x31   : > { %2130 = dma.done.wait (%p1902_p8), [#allocation4], 16  }
  0x32   : > { %2132 = vsyncadd (%p1902_p8), [#allocation4], 4294967280  ;;  %s265_s20 = sand.u32 1, %s2135_s21  }
  0x33   : > { %s1791_s23 = sshll.u32 %s265_s20, 6 }
  0x34   : > { %s2263_s26 = scalar_lea.vmem [#allocation5], %s1791_s23 }
  0x35   : > { %271 = sfence }
  0x36   : > { %v2266_v8 = vld [vmem:[%s2263_s26] sm:$0xff]  ;;  %s2146_s27 = smov 16   ;;  %s2147_s29 = smov 17   ;;  %v2273_v9 = vld [vmem:[%s2263_s26 + $0x8] sm:$0xff]  ;;  %v2292_v10 = vld [vmem:[%s2263_s26 + $0x18] sm:$0xff]  ;;  %v2153_v12 = vmov 0   ;;  %v297_v17 = vlaneseq }
  0x37   : > { %477 = vrot.lane.b32.xlu1 %v2266_v8, %s2146_s27  ;;  %468 = vrot.lane.b32.xlu0 %v2266_v8, %s2147_s29  ;;  %s2148_s7 = smov 15   ;;  %s2149_s8 = smov 1   ;;  %v2295_v11 = vld [vmem:[%s2263_s26 + $0x10] sm:$0xff]  ;;  %v2341_v13 = vld [vmem:[%s2263_s26 + $0x28] sm:$0xff]  ;;  %v2155_v31 = vmov 0.0  }
  0x38   : > { %s2150_s9 = smov 127   ;;  %s2151_s10 = smov 113   ;;  %848 = vmatprep.mubr.bf16.mxu0 %v2153_v12  ;;  %889 = vmatprep.mubr.bf16.mxu1 %v2153_v12  ;;  %v2344_v14 = vld [vmem:[%s2263_s26 + $0x20] sm:$0xff]  ;;  %v2379_v15 = vld [vmem:[%s2263_s26 + $0x38] sm:$0xff]  ;;  %v2382_v16 = vld [vmem:[%s2263_s26 + $0x30] sm:$0xff]  ;;  %v2392_v18 = vand.u32 127, %v297_v17 }
  0x39   : > { %s2152_s11 = smov 112   ;;  %1941 = vset.pattern.permute.xlu0 %v2153_v12  ;;  %s2154_s12 = smov 111   ;;  %v781_v55 = vld [vmem:[%s3141_s3] sm:$0xff] }
  0x3a   : > { %v2399_v19 = vadd.s32 128, %v2392_v18  ;;  %v304_v20 = vand.u32 15, %v2392_v18  ;;  %v324_v22 = vadd.s32 4294967279, %v2392_v18  ;;  %v346_v24 = vadd.s32 4294967280, %v2392_v18  ;;  %s295_s17 = sld [smem:[#allocation3]]  ;;  %p3158_p4 = scmp.ne.s32.totalorder %s3151_s30, 0 }
  0x3b   : > { %479 = vrot.lane.b32.xlu1 %v2273_v9, %s2146_s27  ;;  %470 = vrot.lane.b32.xlu0 %v2273_v9, %s2147_s29  ;;  %v366_v28 = vadd.s32 4294967281, %v2392_v18  ;;  %v388_v30 = vadd.s32 4294967295, %v2392_v18  ;;  %vm481_vm5 = vcmp.lt.s32.totalorder %v2392_v18, 16  ;;  %vm472_vm6 = vcmp.lt.s32.totalorder %v2392_v18, 17  ;;  %s1893_s21 = sshll.u32 (%p3158_p4), %s2209_s24, 3 }
  0x3c   : > { %v311_v21 = vand.u32 15, %v2399_v19  ;;  %v2408_v23 = vadd.s32 4294967295, %v304_v20  ;;  %vm326_vm0 = vcmp.ge.s32.totalorder %v324_v22, 0  ;;  %vm348_vm2 = vcmp.ge.s32.totalorder %v346_v24, 0 }
  0x3d   : > { %v374_v29 = vadd.s32 1, %v304_v20  ;;  %v2434_v32 = vsel %vm348_vm2, 1.0, %v2155_v31  ;;  %vm368_vm7 = vcmp.ge.s32.totalorder %v366_v28, 0  ;;  %v403_v38 = vadd.s32 1, %v2399_v19 }
  0x3e   : > { %v2415_v25 = vadd.s32 4294967295, %v311_v21  ;;  %vm334_vm1 = vcmp.ge.s32.totalorder %v2408_v23, 0  ;;  %v2444_v37 = vadd.s32 1, %v311_v21  ;;  %vm390_vm9 = vcmp.ge.s32.totalorder %v388_v30, 0 }
  0x3f   : > { %488 = vrot.lane.b32.xlu1 %v2273_v9, %s2148_s7  ;;  %486 = vrot.lane.b32.xlu0 %v2266_v8, %s2148_s7  ;;  %vm340_vm3 = vmand %vm326_vm0, %vm334_vm1  ;;  %vm378_vm8 = vcmp.le.s32.totalorder %v374_v29, 15  ;;  %vm490_vm12 = vcmp.lt.s32.totalorder %v2392_v18, 15  ;;  %vm407_vm14 = vcmp.lt.s32.totalorder %v403_v38, 256  ;;  %vm499_vm15 = vcmp.lt.s32.totalorder %v2392_v18, 1 }
  0x40   : > { %vm335_vm4 = vcmp.ge.s32.totalorder %v2415_v25, 0  ;;  %v2437_v33 = vsel %vm340_vm3, 1.0, %v2155_v31  ;;  %vm382_vm10 = vmand %vm368_vm7, %vm378_vm8  ;;  %vm379_vm11 = vcmp.le.s32.totalorder %v2444_v37, 15  ;;  %vm508_vm2 = vcmp.lt.s32.totalorder %v2392_v18, 127 }
  0x41   : > { %v2442_v34 = vsel %vm335_vm4, 1.0, %v2155_v31  ;;  %vm396_vm13 = vmand %vm390_vm9, %vm334_vm1  ;;  %v2468_v50 = vsel %vm382_vm10, 1.0, %v2155_v31  ;;  %v2478_v51 = vsel %vm379_vm11, 1.0, %v2155_v31  ;;  %v2503_v0 = vsel %vm378_vm8, 1.0, %v2155_v31 }
  0x42   : > { %v2485_v54 = vsel %vm396_vm13, 1.0, %v2155_v31  ;;  %vm411_vm0 = vmand %vm407_vm14, %vm379_vm11  ;;  %v417_v28 = vadd.s32 15, %v2399_v19  ;;  %v431_v38 = vadd.s32 16, %v2399_v19  ;;  %vm517_vm8 = vcmp.lt.s32.totalorder %v2392_v18, 113 }
  0x43   : > { %497 = vrot.lane.b32.xlu1 %v2273_v9, %s2149_s8  ;;  %495 = vrot.lane.b32.xlu0 %v2266_v8, %s2149_s8  ;;  %v2506_v1 = vsel %vm411_vm0, 1.0, %v2155_v31  ;;  %vm526_vm10 = vcmp.lt.s32.totalorder %v2392_v18, 112  ;;  %v2544_v25 = vsel %vm334_vm1, 1.0, %v2155_v31  ;;  %vm535_vm13 = vcmp.lt.s32.totalorder %v2392_v18, 111 }
  0x44   : > { %vm421_vm3 = vcmp.lt.s32.totalorder %v417_v28, 256  ;;  %vm435_vm9 = vcmp.lt.s32.totalorder %v431_v38, 256  ;;  %vm787_vm14 = vcmask 588800  }
  0x45   : > { %vm425_vm7 = vmand %vm421_vm3, %vm335_vm4 }
  0x47   : > { %506 = vrot.lane.b32.xlu1 %v2273_v9, %s2150_s9  ;;  %504 = vrot.lane.b32.xlu0 %v2266_v8, %s2150_s9 }
  0x4b   : > { %555 = vrot.lane.b32.xlu1 %v2292_v10, %s2147_s29  ;;  %553 = vrot.lane.b32.xlu0 %v2295_v11, %s2147_s29 }
  0x4f   : > { %563 = vrot.lane.b32.xlu1 %v2292_v10, %s2146_s27  ;;  %561 = vrot.lane.b32.xlu0 %v2295_v11, %s2146_s27 }
  0x53   : > { %515 = vrot.lane.b32.xlu1 %v2273_v9, %s2151_s10  ;;  %513 = vrot.lane.b32.xlu0 %v2266_v8, %s2151_s10 }
  0x57   : > { %524 = vrot.lane.b32.xlu1 %v2273_v9, %s2152_s11  ;;  %522 = vrot.lane.b32.xlu0 %v2266_v8, %s2152_s11 }
  0x5b   : > { %571 = vrot.lane.b32.xlu1 %v2292_v10, %s2148_s7  ;;  %569 = vrot.lane.b32.xlu0 %v2295_v11, %s2148_s7 }
  0x5f   : > { %579 = vrot.lane.b32.xlu1 %v2292_v10, %s2149_s8  ;;  %577 = vrot.lane.b32.xlu0 %v2295_v11, %s2149_s8 }
  0x63   : > { %533 = vrot.lane.b32.xlu1 %v2273_v9, %s2154_s12  ;;  %531 = vrot.lane.b32.xlu0 %v2266_v8, %s2154_s12 }
  0x67   : > { %587 = vrot.lane.b32.xlu1 %v2292_v10, %s2150_s9  ;;  %585 = vrot.lane.b32.xlu0 %v2295_v11, %s2150_s9 }
  0x6b   : > { %595 = vrot.lane.b32.xlu1 %v2292_v10, %s2151_s10  ;;  %593 = vrot.lane.b32.xlu0 %v2295_v11, %s2151_s10 }
  0x6f   : > { %603 = vrot.lane.b32.xlu1 %v2292_v10, %s2152_s11  ;;  %601 = vrot.lane.b32.xlu0 %v2295_v11, %s2152_s11 }
  0x73   : > { %632 = vrot.lane.b32.xlu1 %v2341_v13, %s2147_s29  ;;  %630 = vrot.lane.b32.xlu0 %v2344_v14, %s2147_s29 }
  0x77   : > { %640 = vrot.lane.b32.xlu1 %v2341_v13, %s2146_s27  ;;  %638 = vrot.lane.b32.xlu0 %v2344_v14, %s2146_s27 }
  0x7b   : > { %611 = vrot.lane.b32.xlu1 %v2292_v10, %s2154_s12  ;;  %609 = vrot.lane.b32.xlu0 %v2295_v11, %s2154_s12 }
  0x7f   : > { %648 = vrot.lane.b32.xlu1 %v2341_v13, %s2148_s7  ;;  %646 = vrot.lane.b32.xlu0 %v2344_v14, %s2148_s7 }
  0x83   : > { %656 = vrot.lane.b32.xlu1 %v2341_v13, %s2149_s8  ;;  %654 = vrot.lane.b32.xlu0 %v2344_v14, %s2149_s8 }
  0x87   : > { %664 = vrot.lane.b32.xlu1 %v2341_v13, %s2150_s9  ;;  %662 = vrot.lane.b32.xlu0 %v2344_v14, %s2150_s9 }
  0x8b   : > { %672 = vrot.lane.b32.xlu1 %v2341_v13, %s2151_s10  ;;  %670 = vrot.lane.b32.xlu0 %v2344_v14, %s2151_s10 }
  0x8f   : > { %680 = vrot.lane.b32.xlu1 %v2341_v13, %s2152_s11  ;;  %678 = vrot.lane.b32.xlu0 %v2344_v14, %s2152_s11 }
  0x93   : > { %709 = vrot.lane.b32.xlu1 %v2379_v15, %s2147_s29  ;;  %707 = vrot.lane.b32.xlu0 %v2382_v16, %s2147_s29 }
  0x97   : > { %717 = vrot.lane.b32.xlu1 %v2379_v15, %s2146_s27  ;;  %715 = vrot.lane.b32.xlu0 %v2382_v16, %s2146_s27 }
  0x9b   : > { %688 = vrot.lane.b32.xlu1 %v2341_v13, %s2154_s12  ;;  %686 = vrot.lane.b32.xlu0 %v2344_v14, %s2154_s12 }
  0x9f   : > { %725 = vrot.lane.b32.xlu1 %v2379_v15, %s2148_s7  ;;  %723 = vrot.lane.b32.xlu0 %v2382_v16, %s2148_s7 }
  0xa3   : > { %733 = vrot.lane.b32.xlu1 %v2379_v15, %s2149_s8  ;;  %731 = vrot.lane.b32.xlu0 %v2382_v16, %s2149_s8 }
  0xa7   : > { %741 = vrot.lane.b32.xlu1 %v2379_v15, %s2150_s9  ;;  %739 = vrot.lane.b32.xlu0 %v2382_v16, %s2150_s9 }
  0xa9   : > { %v478_v26 = vpop.permute.xlu1 %477  ;;  %v469_v27 = vpop.permute.xlu0 %468 }
  0xab   : > { %749 = vrot.lane.b32.xlu1 %v2379_v15, %s2151_s10  ;;  %747 = vrot.lane.b32.xlu0 %v2382_v16, %s2151_s10 }
  0xad   : > { %v480_v35 = vpop.permute.xlu1 %479  ;;  %v471_v36 = vpop.permute.xlu0 %470 }
  0xae   : > { %v483_v39 = vsel %vm481_vm5, %v480_v35, %v478_v26  ;;  %v473_v40 = vsel %vm472_vm6, %v469_v27, %v471_v36  ;;  %v474_v41 = vsel %vm472_vm6, %v471_v36, %v469_v27  ;;  %v482_v45 = vsel %vm481_vm5, %v478_v26, %v480_v35 }
  0xaf   : > { %v484_v42 = vmul.f32 %v2434_v32, %v483_v39  ;;  %v475_v43 = vmul.f32 %v2437_v33, %v474_v41  ;;  %757 = vrot.lane.b32.xlu1 %v2379_v15, %s2152_s11  ;;  %755 = vrot.lane.b32.xlu0 %v2382_v16, %s2152_s11  ;;  %v476_v44 = vmul.f32 %v2442_v34, %v473_v40 }
  0xb1   : > { %v489_v46 = vpop.permute.xlu1 %488  ;;  %v487_v47 = vpop.permute.xlu0 %486  ;;  %v541_v48 = vpack.c.bf16 %v482_v45, %v476_v44  ;;  %v540_v49 = vpack.c.bf16 %v484_v42, %v475_v43  ;;  %v2534_v45 = vsel %vm425_vm7, 1.0, %v2155_v31 }
  0xb2   : > { %v491_v52 = vsel %vm490_vm12, %v487_v47, %v489_v46  ;;  %v492_v53 = vsel %vm490_vm12, %v489_v46, %v487_v47  ;;  %v2539_v47 = vsel %vm435_vm9, 1.0, %v2155_v31 }
  0xb3   : > { %765 = vrot.lane.b32.xlu1 %v2379_v15, %s2154_s12  ;;  %763 = vrot.lane.b32.xlu0 %v2382_v16, %s2154_s12  ;;  %v493_v60 = vmul.f32 %v2468_v50, %v492_v53  ;;  %v494_v61 = vmul.f32 %v2478_v51, %v491_v52 }
  0xb4   : > { %816 = vmatprep.subr.bf16.mxu0 %v541_v48 }
  0xb5   : > { %817 = vmatpush1.bf16.msra.mxu0 %v540_v49  ;;  %v498_v56 = vpop.permute.xlu1 %497  ;;  %v496_v57 = vpop.permute.xlu0 %495 }
  0xb6   : > { %v500_v58 = vsel %vm499_vm15, %v496_v57, %v498_v56  ;;  %v501_v59 = vsel %vm499_vm15, %v498_v56, %v496_v57 }
  0xb7   : > { %v502_v62 = vmul.f32 %v2485_v54, %v501_v59  ;;  %v503_v63 = vmul.f32 %v2442_v34, %v500_v58  ;;  %784 = vperm.xlu0 %1941, %v781_v55   ;;  %v445_v55 = vadd.s32 17, %v2399_v19 }
  0xb9   : > { %v507_v2 = vpop.permute.xlu1 %506  ;;  %v505_v3 = vpop.permute.xlu0 %504  ;;  %v543_v4 = vpack.c.bf16 %v503_v63, %v494_v61  ;;  %v542_v5 = vpack.c.bf16 %v502_v62, %v493_v60  ;;  %vm449_vm1 = vcmp.lt.s32.totalorder %v445_v55, 256 }
  0xba   : > { %v509_v6 = vsel %vm508_vm2, %v505_v3, %v507_v2  ;;  %v510_v7 = vsel %vm508_vm2, %v507_v2, %v505_v3  ;;  %vm453_vm4 = vmand %vm449_vm1, %vm379_vm11  ;;  %vm791_vm11 = vcmask 1043456  }
  0xbb   : > { %v511_v17 = vmul.f32 %v2503_v0, %v509_v6  ;;  %v512_v20 = vmul.f32 %v2506_v1, %v510_v7  ;;  %818 = vmatprep.subr.bf16.mxu0 %v543_v4 }
  0xbc   : > { %819 = vmatpush1.bf16.msra.mxu0 %v542_v5 }
  0xbd   : > { %v556_v21 = vpop.permute.xlu1 %555  ;;  %v554_v22 = vpop.permute.xlu0 %553  ;;  %v545_v24 = vpack.c.bf16 %v512_v20, %v2273_v9  ;;  %v544_v26 = vpack.c.bf16 %v511_v17, %v2266_v8 }
  0xbe   : > { %v557_v27 = vsel %vm472_vm6, %v554_v22, %v556_v21  ;;  %v558_v29 = vsel %vm472_vm6, %v556_v21, %v554_v22  ;;  %v2572_v21 = vsel %vm453_vm4, 1.0, %v2155_v31 }
  0xbf   : > { %820 = vmatprep.subr.bf16.mxu0 %v545_v24  ;;  %v560_v36 = vmul.f32 %v2442_v34, %v557_v27  ;;  %v559_v39 = vmul.f32 %v2437_v33, %v558_v29 }
  0xc0   : > { %821 = vmatpush1.bf16.msra.mxu0 %v544_v26 }
  0xc1   : > { %v564_v30 = vpop.permute.xlu1 %563  ;;  %v562_v35 = vpop.permute.xlu0 %561 }
  0xc2   : > { %v566_v9 = vsel %vm481_vm5, %v564_v30, %v562_v35  ;;  %v565_v8 = vsel %vm481_vm5, %v562_v35, %v564_v30 }
  0xc3   : > { %v567_v40 = vmul.f32 %v2434_v32, %v566_v9  ;;  %v618_v41 = vpack.c.bf16 %v565_v8, %v560_v36 }
  0xc5   : > { %v516_v42 = vpop.permute.xlu1 %515  ;;  %v514_v43 = vpop.permute.xlu0 %513  ;;  %857 = vmatprep.subr.bf16.mxu1 %v618_v41  ;;  %v617_v44 = vpack.c.bf16 %v567_v40, %v559_v39 }
  0xc6   : > { %v519_v46 = vsel %vm517_vm8, %v516_v42, %v514_v43  ;;  %v518_v48 = vsel %vm517_vm8, %v514_v43, %v516_v42  ;;  %v2591_v43 = vld [vmem:[%s3140_s2] sm:$0xf] }
  0xc7   : > { %858 = vmatpush1.bf16.msra.mxu1 %v617_v44  ;;  %v521_v56 = vmul.f32 %v2534_v45, %v519_v46  ;;  %v520_v23 = vmul.f32 %v2544_v25, %v518_v48 }
  0xc9   : > { %v525_v49 = vpop.permute.xlu1 %524  ;;  %v523_v52 = vpop.permute.xlu0 %522 }
  0xca   : > { %v528_v53 = vsel %vm526_vm10, %v525_v49, %v523_v52  ;;  %v527_v57 = vsel %vm526_vm10, %v523_v52, %v525_v49 }
  0xcb   : > { %v530_v58 = vmul.f32 %v2539_v47, %v528_v53  ;;  %v546_v62 = vpack.c.bf16 %v527_v57, %v520_v23 }
  0xcd   : > { %v572_v59 = vpop.permute.xlu1 %571  ;;  %v570_v60 = vpop.permute.xlu0 %569  ;;  %v547_v61 = vpack.c.bf16 %v530_v58, %v521_v56 }
  0xce   : > { %v573_v63 = vsel %vm490_vm12, %v570_v60, %v572_v59  ;;  %v574_v19 = vsel %vm490_vm12, %v572_v59, %v570_v60 }
  0xcf   : > { %822 = vmatprep.subr.bf16.mxu0 %v547_v61  ;;  %v575_v6 = vmul.f32 %v2468_v50, %v574_v19  ;;  %v576_v7 = vmul.f32 %v2478_v51, %v573_v63 }
  0xd0   : > { %823 = vmatpush1.bf16.msra.mxu0 %v546_v62 }
  0xd1   : > { %v580_v2 = vpop.permute.xlu1 %579  ;;  %v578_v3 = vpop.permute.xlu0 %577 }
  0xd2   : > { %v581_v4 = vsel %vm499_vm15, %v578_v3, %v580_v2  ;;  %v582_v5 = vsel %vm499_vm15, %v580_v2, %v578_v3 }
  0xd3   : > { %v583_v17 = vmul.f32 %v2485_v54, %v582_v5  ;;  %v584_v20 = vmul.f32 %v2442_v34, %v581_v4 }
  0xd5   : > { %v534_v37 = vpop.permute.xlu1 %533  ;;  %v532_v22 = vpop.permute.xlu0 %531  ;;  %v620_v24 = vpack.c.bf16 %v584_v20, %v576_v7  ;;  %v619_v26 = vpack.c.bf16 %v583_v17, %v575_v6 }
  0xd6   : > { %v536_v27 = vsel %vm535_vm13, %v532_v22, %v534_v37  ;;  %v537_v28 = vsel %vm535_vm13, %v534_v37, %v532_v22 }
  0xd7   : > { %v538_v29 = vmul.f32 %v2503_v0, %v536_v27  ;;  %v539_v30 = vmul.f32 %v2572_v21, %v537_v28  ;;  %859 = vmatprep.subr.bf16.mxu1 %v620_v24 }
  0xd8   : > { %860 = vmatpush1.bf16.msra.mxu1 %v619_v26 }
  0xd9   : > { %v548_v35 = vpack.c.bf16 %v538_v29, %v538_v29  ;;  %v549_v36 = vpack.c.bf16 %v539_v30, %v539_v30  ;;  %v588_v38 = vpop.permute.xlu1 %587  ;;  %v586_v9 = vpop.permute.xlu0 %585 }
  0xda   : > { %v589_v8 = vsel %vm508_vm2, %v586_v9, %v588_v38  ;;  %v590_v39 = vsel %vm508_vm2, %v588_v38, %v586_v9 }
  0xdb   : > { %v591_v40 = vmul.f32 %v2503_v0, %v589_v8  ;;  %v592_v41 = vmul.f32 %v2506_v1, %v590_v39  ;;  %1814 = vmatprep.subr.msk.bf16.mxu0 %vm791_vm11, %v549_v36  ;;  %v793_v42 = vsel %vm791_vm11, %v548_v35, 0 }
  0xdc   : > { %825 = vmatpush1.bf16.msra.mxu0 %v793_v42 }
  0xdd   : > { %v596_v44 = vpop.permute.xlu1 %595  ;;  %v594_v46 = vpop.permute.xlu0 %593  ;;  %v622_v48 = vpack.c.bf16 %v592_v41, %v2292_v10  ;;  %v621_v49 = vpack.c.bf16 %v591_v40, %v2295_v11 }
  0xde   : > { %v598_v52 = vsel %vm517_vm8, %v596_v44, %v594_v46  ;;  %v597_v53 = vsel %vm517_vm8, %v594_v46, %v596_v44 }
  0xdf   : > { %1815 = vmatmul.mubr.msk.bf16.vlgmr.msra.gmra.mrb[0].mxu0 %vm787_vm14, %v2591_v43  ;;  %861 = vmatprep.subr.bf16.mxu1 %v622_v48  ;;  %v600_v11 = vmul.f32 %v2534_v45, %v598_v52  ;;  %v599_v23 = vmul.f32 %v2544_v25, %v597_v53 }
  0xe0   : > { %862 = vmatpush1.bf16.msra.mxu1 %v621_v49  ;;  %930 = vmatprep.mubr.bf16.mxu0 %v2153_v12 }
  0xe1   : > { %v604_v55 = vpop.permute.xlu1 %603  ;;  %v602_v56 = vpop.permute.xlu0 %601 }
  0xe2   : > { %v606_v10 = vsel %vm526_vm10, %v604_v55, %v602_v56  ;;  %v605_v57 = vsel %vm526_vm10, %v602_v56, %v604_v55 }
  0xe3   : > { %v608_v58 = vmul.f32 %v2539_v47, %v606_v10  ;;  %v623_v62 = vpack.c.bf16 %v605_v57, %v599_v23 }
  0xe5   : > { %v633_v59 = vpop.permute.xlu1 %632  ;;  %v631_v60 = vpop.permute.xlu0 %630  ;;  %v624_v61 = vpack.c.bf16 %v608_v58, %v600_v11 }
  0xe6   : > { %v634_v63 = vsel %vm472_vm6, %v631_v60, %v633_v59  ;;  %v635_v19 = vsel %vm472_vm6, %v633_v59, %v631_v60 }
  0xe7   : > { %863 = vmatprep.subr.bf16.mxu1 %v624_v61  ;;  %v637_v2 = vmul.f32 %v2442_v34, %v634_v63  ;;  %v636_v7 = vmul.f32 %v2437_v33, %v635_v19 }
  0xe8   : > { %864 = vmatpush1.bf16.msra.mxu1 %v623_v62 }
  0xe9   : > { %v641_v3 = vpop.permute.xlu1 %640  ;;  %v639_v4 = vpop.permute.xlu0 %638 }
  0xea   : > { %v642_v5 = vsel %vm481_vm5, %v639_v4, %v641_v3  ;;  %v643_v6 = vsel %vm481_vm5, %v641_v3, %v639_v4 }
  0xeb   : > { %v644_v17 = vmul.f32 %v2434_v32, %v643_v6  ;;  %v695_v20 = vpack.c.bf16 %v642_v5, %v637_v2 }
  0xed   : > { %v694_v37 = vpack.c.bf16 %v644_v17, %v636_v7  ;;  %v612_v22 = vpop.permute.xlu1 %611  ;;  %v610_v24 = vpop.permute.xlu0 %609  ;;  %898 = vmatprep.subr.bf16.mxu0 %v695_v20 }
  0xee   : > { %v613_v26 = vsel %vm535_vm13, %v610_v24, %v612_v22  ;;  %v614_v27 = vsel %vm535_vm13, %v612_v22, %v610_v24 }
  0xef   : > { %v615_v28 = vmul.f32 %v2503_v0, %v613_v26  ;;  %v616_v29 = vmul.f32 %v2572_v21, %v614_v27  ;;  %899 = vmatpush1.bf16.msra.mxu0 %v694_v37 }
  0xf1   : > { %v625_v30 = vpack.c.bf16 %v615_v28, %v615_v28  ;;  %v626_v35 = vpack.c.bf16 %v616_v29, %v616_v29  ;;  %v649_v36 = vpop.permute.xlu1 %648  ;;  %v647_v38 = vpop.permute.xlu0 %646 }
  0xf2   : > { %v650_v8 = vsel %vm490_vm12, %v647_v38, %v649_v36  ;;  %v651_v39 = vsel %vm490_vm12, %v649_v36, %v647_v38 }
  0xf3   : > { %1816 = vmatprep.subr.msk.bf16.mxu1 %vm791_vm11, %v626_v35  ;;  %v799_v9 = vsel %vm791_vm11, %v625_v30, 0  ;;  %v652_v46 = vmul.f32 %v2468_v50, %v651_v39  ;;  %v653_v48 = vmul.f32 %v2478_v51, %v650_v8 }
  0xf4   : > { %866 = vmatpush1.bf16.msra.mxu1 %v799_v9 }
  0xf5   : > { %v657_v40 = vpop.permute.xlu1 %656  ;;  %v655_v41 = vpop.permute.xlu0 %654 }
  0xf6   : > { %v658_v42 = vsel %vm499_vm15, %v655_v41, %v657_v40  ;;  %v659_v44 = vsel %vm499_vm15, %v657_v40, %v655_v41 }
  0xf7   : > { %v660_v49 = vmul.f32 %v2485_v54, %v659_v44  ;;  %v661_v52 = vmul.f32 %v2442_v34, %v658_v42  ;;  %1817 = vmatmul.mubr.msk.bf16.vlgmr.msra.gmra.mrb[0].mxu1 %vm787_vm14, %v2591_v43 }
  0xf8   : > { %971 = vmatprep.mubr.bf16.mxu1 %v2153_v12 }
  0xf9   : > { %v696_v53 = vpack.c.bf16 %v660_v49, %v652_v46  ;;  %v665_v55 = vpop.permute.xlu1 %664  ;;  %v663_v56 = vpop.permute.xlu0 %662  ;;  %v697_v10 = vpack.c.bf16 %v661_v52, %v653_v48 }
  0xfa   : > { %v666_v11 = vsel %vm508_vm2, %v663_v56, %v665_v55  ;;  %v667_v57 = vsel %vm508_vm2, %v665_v55, %v663_v56 }
  0xfb   : > { %v668_v58 = vmul.f32 %v2503_v0, %v666_v11  ;;  %v669_v23 = vmul.f32 %v2506_v1, %v667_v57  ;;  %900 = vmatprep.subr.bf16.mxu0 %v697_v10 }
  0xfc   : > { %901 = vmatpush1.bf16.msra.mxu0 %v696_v53 }
  0xfd   : > { %v698_v59 = vpack.c.bf16 %v668_v58, %v2344_v14  ;;  %v673_v60 = vpop.permute.xlu1 %672  ;;  %v671_v61 = vpop.permute.xlu0 %670  ;;  %v699_v62 = vpack.c.bf16 %v669_v23, %v2341_v13 }
  0xfe   : > { %v675_v63 = vsel %vm517_vm8, %v673_v60, %v671_v61  ;;  %v674_v19 = vsel %vm517_vm8, %v671_v61, %v673_v60 }
  0xff   : > { %902 = vmatprep.subr.bf16.mxu0 %v699_v62  ;;  %v677_v5 = vmul.f32 %v2534_v45, %v675_v63  ;;  %v676_v6 = vmul.f32 %v2544_v25, %v674_v19 }
 0x100   : > { %903 = vmatpush1.bf16.msra.mxu0 %v698_v59 }
 0x101   : > { %v681_v2 = vpop.permute.xlu1 %680  ;;  %v679_v3 = vpop.permute.xlu0 %678 }
 0x102   : > { %v683_v4 = vsel %vm526_vm10, %v681_v2, %v679_v3  ;;  %v682_v14 = vsel %vm526_vm10, %v679_v3, %v681_v2 }
 0x103   : > { %v685_v13 = vmul.f32 %v2539_v47, %v683_v4  ;;  %v700_v37 = vpack.c.bf16 %v682_v14, %v676_v6 }
 0x105   : > { %v710_v7 = vpop.permute.xlu1 %709  ;;  %v708_v17 = vpop.permute.xlu0 %707  ;;  %v701_v20 = vpack.c.bf16 %v685_v13, %v677_v5 }
 0x106   : > { %v711_v22 = vsel %vm472_vm6, %v708_v17, %v710_v7  ;;  %v712_v24 = vsel %vm472_vm6, %v710_v7, %v708_v17 }
 0x107   : > { %904 = vmatprep.subr.bf16.mxu0 %v701_v20  ;;  %v714_v26 = vmul.f32 %v2442_v34, %v711_v22  ;;  %v713_v35 = vmul.f32 %v2437_v33, %v712_v24 }
 0x108   : > { %905 = vmatpush1.bf16.msra.mxu0 %v700_v37 }
 0x109   : > { %v718_v27 = vpop.permute.xlu1 %717  ;;  %v716_v28 = vpop.permute.xlu0 %715 }
 0x10a   : > { %v719_v29 = vsel %vm481_vm5, %v716_v28, %v718_v27  ;;  %v720_v30 = vsel %vm481_vm5, %v718_v27, %v716_v28 }
 0x10b   : > { %v721_v36 = vmul.f32 %v2434_v32, %v720_v30  ;;  %v772_v38 = vpack.c.bf16 %v719_v29, %v714_v26 }
 0x10d   : > { %v771_v9 = vpack.c.bf16 %v721_v36, %v713_v35  ;;  %v689_v8 = vpop.permute.xlu1 %688  ;;  %v687_v39 = vpop.permute.xlu0 %686  ;;  %939 = vmatprep.subr.bf16.mxu1 %v772_v38 }
 0x10e   : > { %v690_v40 = vsel %vm535_vm13, %v687_v39, %v689_v8  ;;  %v691_v41 = vsel %vm535_vm13, %v689_v8, %v687_v39 }
 0x10f   : > { %v692_v42 = vmul.f32 %v2503_v0, %v690_v40  ;;  %v693_v44 = vmul.f32 %v2572_v21, %v691_v41  ;;  %940 = vmatpush1.bf16.msra.mxu1 %v771_v9 }
 0x111   : > { %v702_v46 = vpack.c.bf16 %v692_v42, %v692_v42  ;;  %v703_v48 = vpack.c.bf16 %v693_v44, %v693_v44  ;;  %v726_v49 = vpop.permute.xlu1 %725  ;;  %v724_v52 = vpop.permute.xlu0 %723 }
 0x112   : > { %v727_v55 = vsel %vm490_vm12, %v724_v52, %v726_v49  ;;  %v728_v56 = vsel %vm490_vm12, %v726_v49, %v724_v52 }
 0x113   : > { %1818 = vmatprep.subr.msk.bf16.mxu0 %vm791_vm11, %v703_v48  ;;  %v805_v53 = vsel %vm791_vm11, %v702_v46, 0  ;;  %v729_v23 = vmul.f32 %v2468_v50, %v728_v56  ;;  %v730_v59 = vmul.f32 %v2478_v51, %v727_v55  ;;  %v2728_v48 = vstv %s295_s17 }
 0x114   : > { %907 = vmatpush1.bf16.msra.mxu0 %v805_v53 }
 0x115   : > { %v734_v10 = vpop.permute.xlu1 %733  ;;  %v732_v11 = vpop.permute.xlu0 %731 }
 0x116   : > { %v735_v57 = vsel %vm499_vm15, %v732_v11, %v734_v10  ;;  %v736_v58 = vsel %vm499_vm15, %v734_v10, %v732_v11 }
 0x117   : > { %v737_v60 = vmul.f32 %v2485_v54, %v736_v58  ;;  %v738_v61 = vmul.f32 %v2442_v34, %v735_v57  ;;  %1819 = vmatmul.mubr.msk.bf16.vlgmr.msra.gmra.mrb[4].mxu0 %vm787_vm14, %v2591_v43 }
 0x118   : > { %1123 = vmatprep.mubr.bf16.mxu0 %v2153_v12 }
 0x119   : > { %v773_v62 = vpack.c.bf16 %v737_v60, %v729_v23  ;;  %v742_v63 = vpop.permute.xlu1 %741  ;;  %v740_v19 = vpop.permute.xlu0 %739  ;;  %v774_v2 = vpack.c.bf16 %v738_v61, %v730_v59 }
 0x11a   : > { %v743_v3 = vsel %vm508_vm2, %v740_v19, %v742_v63  ;;  %v744_v4 = vsel %vm508_vm2, %v742_v63, %v740_v19 }
 0x11b   : > { %v745_v5 = vmul.f32 %v2503_v0, %v743_v3  ;;  %v746_v14 = vmul.f32 %v2506_v1, %v744_v4  ;;  %941 = vmatprep.subr.bf16.mxu1 %v774_v2 }
 0x11c   : > { %942 = vmatpush1.bf16.msra.mxu1 %v773_v62 }
 0x11d   : > { %v775_v13 = vpack.c.bf16 %v745_v5, %v2382_v16  ;;  %v750_v6 = vpop.permute.xlu1 %749  ;;  %v748_v7 = vpop.permute.xlu0 %747  ;;  %v776_v17 = vpack.c.bf16 %v746_v14, %v2379_v15 }
 0x11e   : > { %v752_v20 = vsel %vm517_vm8, %v750_v6, %v748_v7  ;;  %v751_v37 = vsel %vm517_vm8, %v748_v7, %v750_v6 }
 0x11f   : > { %943 = vmatprep.subr.bf16.mxu1 %v776_v17  ;;  %v754_v27 = vmul.f32 %v2534_v45, %v752_v20  ;;  %v753_v28 = vmul.f32 %v2544_v25, %v751_v37 }
 0x120   : > { %944 = vmatpush1.bf16.msra.mxu1 %v775_v13 }
 0x121   : > { %v758_v22 = vpop.permute.xlu1 %757  ;;  %v756_v24 = vpop.permute.xlu0 %755 }
 0x122   : > { %v760_v26 = vsel %vm526_vm10, %v758_v22, %v756_v24  ;;  %v759_v16 = vsel %vm526_vm10, %v756_v24, %v758_v22 }
 0x123   : > { %v762_v15 = vmul.f32 %v2539_v47, %v760_v26  ;;  %v777_v36 = vpack.c.bf16 %v759_v16, %v753_v28 }
 0x125   : > { %v766_v29 = vpop.permute.xlu1 %765  ;;  %v764_v30 = vpop.permute.xlu0 %763  ;;  %v778_v35 = vpack.c.bf16 %v762_v15, %v754_v27 }
 0x126   : > { %v767_v38 = vsel %vm535_vm13, %v764_v30, %v766_v29  ;;  %v768_v9 = vsel %vm535_vm13, %v766_v29, %v764_v30 }
 0x127   : > { %v769_v8 = vmul.f32 %v2503_v0, %v767_v38  ;;  %v770_v39 = vmul.f32 %v2572_v21, %v768_v9  ;;  %945 = vmatprep.subr.bf16.mxu1 %v778_v35 }
 0x128   : > { %946 = vmatpush1.bf16.msra.mxu1 %v777_v36 }
 0x129   : > { %v779_v40 = vpack.c.bf16 %v769_v8, %v769_v8  ;;  %v780_v41 = vpack.c.bf16 %v770_v39, %v770_v39 }
 0x12b   : > { %1820 = vmatprep.subr.msk.bf16.mxu1 %vm791_vm11, %v780_v41  ;;  %v811_v42 = vsel %vm791_vm11, %v779_v40, 0 }
 0x12c   : > { %948 = vmatpush1.bf16.msra.mxu1 %v811_v42 }
 0x12f   : > { %1821 = vmatmul.mubr.msk.bf16.vlgmr.msra.gmra.mrb[4].mxu1 %vm787_vm14, %v2591_v43 }
 0x130   : > { %1290 = vmatprep.mubr.bf16.mxu1 %v2153_v12 }
 0x136   : > { %v2726_v44 = vpop.permute.xlu0 %784 }
 0x1b2   : > { %v850_v46 = vpop.f32.mrb[0].mxu0 }
 0x1b3   : > { %v851_v49 = vadd.f32 %v850_v46, %v2726_v44  ;;  %v852_v52 = vpop.f32.mrb[1].mxu0 }
 0x1b4   : > { %v853_v53 = vadd.f32 %v852_v52, %v2726_v44  ;;  %v854_v55 = vpop.f32.mrb[2].mxu0 }
 0x1b5   : > { %v2733_v56 = vmul.f32 %v2728_v48, %v851_v49  ;;  %v855_v10 = vpop.f32.mrb[3].mxu0 }
 0x1b6   : > { %v2736_v43 = vmul.f32 %v2728_v48, %v853_v53 }
 0x1b7   : > { %vm998_vm0 = vcmp.ge.f32.partialorder %v2733_v56, 1.0 }
 0x1b8   : > { %vm999_vm3 = vcmp.ge.f32.partialorder %v2736_v43, 1.0  ;;  %v1822_v11 = vsel %vm998_vm0, 1.0, %v2155_v31 }
 0x1b9   : > { %v1823_v57 = vsel %vm999_vm3, 1.0, %v2155_v31  ;;  %v1004_v23 = vsub.f32 1.0, %v1822_v11 }
 0x1ba   : > { %v1942_v58 = vpack.i.bf16 %v1823_v57, %v1822_v11  ;;  %v1005_v59 = vsub.f32 1.0, %v1823_v57 }
 0x1bb   : > { %v1006_v60 = vmul.f32 %v1004_v23, %v2733_v56 }
 0x1bc   : > { %1943 = vrot.lane.b32.xlu1 %v1942_v58, %s2147_s29  ;;  %1953 = vrot.lane.b32.xlu0 %v1942_v58, %s2148_s7  ;;  %v1007_v62 = vmul.f32 %v1005_v59, %v2736_v43 }
 0x1c0   : > { %1948 = vrot.lane.b32.xlu1 %v1942_v58, %s2146_s27  ;;  %1963 = vrot.lane.b32.xlu0 %v1942_v58, %s2150_s9 }
 0x1c4   : > { %1958 = vrot.lane.b32.xlu1 %v1942_v58, %s2149_s8  ;;  %1973 = vrot.lane.b32.xlu0 %v1942_v58, %s2152_s11 }
 0x1c8   : > { %1968 = vrot.lane.b32.xlu1 %v1942_v58, %s2151_s10 }
 0x1ca   : > { %v891_v61 = vpop.f32.mrb[0].mxu1 }
 0x1cb   : > { %v892_v63 = vadd.f32 %v891_v61, %v2726_v44  ;;  %v893_v19 = vpop.f32.mrb[1].mxu1 }
 0x1cc   : > { %v894_v2 = vadd.f32 %v893_v19, %v2726_v44  ;;  %1978 = vrot.lane.b32.xlu1 %v1942_v58, %s2154_s12  ;;  %v895_v3 = vpop.f32.mrb[2].mxu1 }
 0x1cd   : > { %v1162_v4 = vsub.f32 %v892_v63, %v1006_v60  ;;  %v896_v5 = vpop.f32.mrb[3].mxu1 }
 0x1ce   : > { %v1163_v14 = vsub.f32 %v894_v2, %v1007_v62 }
 0x1cf   : > { %v1164_v13 = vmul.f32 %v1162_v4, %v2728_v48 }
 0x1d0   : > { %v1165_v6 = vmul.f32 %v1163_v14, %v2728_v48 }
 0x1d1   : > { %v2760_v7 = vadd.f32 %v1164_v13, %v1006_v60 }
 0x1d2   : > { %v2762_v17 = vadd.f32 %v1165_v6, %v1007_v62 }
 0x1d3   : > { %vm3149_vm7 = vcmp.ge.f32.partialorder %v2760_v7, 1.0 }
 0x1d4   : > { %v1835_v20 = vsel %vm3149_vm7, 1.0, %v2155_v31  ;;  %vm1169_vm9 = vcmp.ge.f32.partialorder %v2762_v17, 1.0 }
 0x1d5   : > { %v1836_v37 = vsel %vm1169_vm9, 1.0, %v2155_v31  ;;  %v1174_v24 = vsub.f32 1.0, %v1835_v20 }
 0x1d6   : > { %v1987_v22 = vpack.i.bf16 %v1836_v37, %v1835_v20  ;;  %v1175_v26 = vsub.f32 1.0, %v1836_v37 }
 0x1d7   : > { %v1176_v15 = vmul.f32 %v1174_v24, %v2760_v7 }
 0x1d8   : > { %1988 = vrot.lane.b32.xlu0 %v1987_v22, %s2146_s27  ;;  %1983 = vrot.lane.b32.xlu1 %v1987_v22, %s2147_s29  ;;  %v1177_v30 = vmul.f32 %v1175_v26, %v2762_v17 }
 0x1dc   : > { %1998 = vrot.lane.b32.xlu0 %v1987_v22, %s2149_s8  ;;  %1993 = vrot.lane.b32.xlu1 %v1987_v22, %s2148_s7 }
 0x1e0   : > { %2003 = vrot.lane.b32.xlu0 %v1987_v22, %s2150_s9  ;;  %2008 = vrot.lane.b32.xlu1 %v1987_v22, %s2151_s10 }
 0x1e4   : > { %2013 = vrot.lane.b32.xlu0 %v1987_v22, %s2152_s11  ;;  %2018 = vrot.lane.b32.xlu1 %v1987_v22, %s2154_s12 }
 0x1ea   : > { %v932_v27 = vpop.f32.mrb[4].mxu0 }
 0x1eb   : > { %v933_v16 = vadd.f32 %v932_v27, %v2726_v44  ;;  %v934_v28 = vpop.f32.mrb[5].mxu0 }
 0x1ec   : > { %v935_v29 = vadd.f32 %v934_v28, %v2726_v44  ;;  %v936_v35 = vpop.f32.mrb[6].mxu0 }
 0x1ed   : > { %v1331_v36 = vsub.f32 %v933_v16, %v1176_v15  ;;  %v937_v38 = vpop.f32.mrb[7].mxu0 }
 0x1ee   : > { %v1332_v9 = vsub.f32 %v935_v29, %v1177_v30 }
 0x1ef   : > { %v1333_v8 = vmul.f32 %v1331_v36, %v2728_v48 }
 0x1f0   : > { %v1334_v39 = vmul.f32 %v1332_v9, %v2728_v48 }
 0x1f1   : > { %v2786_v40 = vadd.f32 %v1333_v8, %v1176_v15 }
 0x1f2   : > { %v2788_v41 = vadd.f32 %v1334_v39, %v1177_v30 }
 0x1f3   : > { %vm3145_vm1 = vcmp.ge.f32.partialorder %v2786_v40, 1.0 }
 0x1f4   : > { %v1851_v42 = vsel %vm3145_vm1, 1.0, %v2155_v31  ;;  %vm3146_vm4 = vcmp.ge.f32.partialorder %v2788_v41, 1.0 }
 0x1f5   : > { %v1852_v46 = vsel %vm3146_vm4, 1.0, %v2155_v31  ;;  %v1343_v52 = vsub.f32 1.0, %v1851_v42 }
 0x1f6   : > { %v2027_v49 = vpack.i.bf16 %v1852_v46, %v1851_v42  ;;  %v1344_v53 = vsub.f32 1.0, %v1852_v46 }
 0x1f7   : > { %v1345_v11 = vmul.f32 %v1343_v52, %v2786_v40 }
 0x1f8   : > { %2028 = vrot.lane.b32.xlu0 %v2027_v49, %s2146_s27  ;;  %2023 = vrot.lane.b32.xlu1 %v2027_v49, %s2147_s29  ;;  %v1346_v23 = vmul.f32 %v1344_v53, %v2788_v41 }
 0x1fc   : > { %2033 = vrot.lane.b32.xlu0 %v2027_v49, %s2148_s7  ;;  %2038 = vrot.lane.b32.xlu1 %v2027_v49, %s2149_s8 }
 0x200   : > { %2043 = vrot.lane.b32.xlu0 %v2027_v49, %s2150_s9  ;;  %2048 = vrot.lane.b32.xlu1 %v2027_v49, %s2151_s10 }
 0x202   : > { %v973_v55 = vpop.f32.mrb[4].mxu1 }
 0x203   : > { %v974_v10 = vadd.f32 %v973_v55, %v2726_v44  ;;  %v975_v57 = vpop.f32.mrb[5].mxu1 }
 0x204   : > { %v976_v58 = vadd.f32 %v975_v57, %v2726_v44  ;;  %v977_v59 = vpop.f32.mrb[6].mxu1  ;;  %2053 = vrot.lane.b32.xlu0 %v2027_v49, %s2152_s11  ;;  %2058 = vrot.lane.b32.xlu1 %v2027_v49, %s2154_s12 }
 0x205   : > { %v1500_v60 = vsub.f32 %v974_v10, %v1345_v11  ;;  %v978_v61 = vpop.f32.mrb[7].mxu1 }
 0x206   : > { %v1501_v62 = vsub.f32 %v976_v58, %v1346_v23 }
 0x207   : > { %v1502_v63 = vmul.f32 %v1500_v60, %v2728_v48 }
 0x208   : > { %v1503_v19 = vmul.f32 %v1501_v62, %v2728_v48  ;;  %v460_v48 = vld [vmem:[%s3143_s5] sm:$0xff] }
 0x209   : > { %v2812_v2 = vadd.f32 %v1502_v63, %v1345_v11 }
 0x20a   : > { %v2814_v3 = vadd.f32 %v1503_v19, %v1346_v23 }
 0x20b   : > { %vm3147_vm1 = vcmp.ge.f32.partialorder %v2812_v2, 1.0 }
 0x20c   : > { %v1867_v44 = vsel %vm3147_vm1, 1.0, %v2155_v31  ;;  %vm3148_vm4 = vcmp.ge.f32.partialorder %v2814_v3, 1.0  ;;  %vm2157_vm1 = vmmov 1  }
 0x20d   : > { %v1868_v4 = vsel %vm3148_vm4, 1.0, %v2155_v31  ;;  %vm1824_vm4 = vmpackc.low %vm2157_vm1, %vm999_vm3  ;;  %vm3153_vm3 = vcmp.ge.f32.partialorder %v2760_v7, 1.0 }
 0x20e   : > { %v2067_v5 = vpack.i.bf16 %v1868_v4, %v1867_v44  ;;  %vm1827_vm7 = vmpackc.low %vm2157_vm1, %vm998_vm0 }
 0x20f   : > { %vm1837_vm0 = vmpackc.low %vm2157_vm1, %vm1169_vm9  ;;  %vm3154_vm9 = vcmp.ge.f32.partialorder %v2788_v41, 1.0 }
 0x210   : > { %2068 = vrot.lane.b32.xlu0 %v2067_v5, %s2146_s27  ;;  %2063 = vrot.lane.b32.xlu1 %v2067_v5, %s2147_s29  ;;  %s1793_s29 = sld [smem:[#allocation3 + $0x1]] }
 0x214   : > { %2073 = vrot.lane.b32.xlu0 %v2067_v5, %s2148_s7  ;;  %2078 = vrot.lane.b32.xlu1 %v2067_v5, %s2149_s8  ;;  %s1792_s7 = sshll.u32 %s265_s20, 5 }
 0x215   : > { %s3088_s8 = scalar_lea.vmem [#allocation6], %s1792_s7 }
 0x218   : > { %2083 = vrot.lane.b32.xlu0 %v2067_v5, %s2150_s9  ;;  %2088 = vrot.lane.b32.xlu1 %v2067_v5, %s2151_s10  ;;  %s1668_s9 = scalar_lea.vmem (%p3158_p4), %s3144_s6, %s1893_s21 }
 0x21c   : > { %2093 = vrot.lane.b32.xlu0 %v2067_v5, %s2152_s11  ;;  %2098 = vrot.lane.b32.xlu1 %v2067_v5, %s2154_s12 }
 0x220   : > { %463 = vperm.xlu0 %1941, %v460_v48  }
 0x22e   : > { %v1944_v14 = vpop.permute.xlu1 %1943  ;;  %v1954_v13 = vpop.permute.xlu0 %1953 }
 0x22f   : > { %v1946_v6 = vunpack.i.h.bf16 %v1944_v14  ;;  %v1945_v20 = vunpack.i.l.bf16 %v1944_v14  ;;  %v1956_v37 = vunpack.i.h.bf16 %v1954_v13  ;;  %v1955_v22 = vunpack.i.l.bf16 %v1954_v13 }
 0x231   : > { %v1012_v24 = vsel %vm472_vm6, %v1945_v20, %v1946_v6  ;;  %v1013_v26 = vsel %vm472_vm6, %v1946_v6, %v1945_v20  ;;  %v1029_v16 = vsel %vm490_vm12, %v1956_v37, %v1955_v22  ;;  %v1028_v8 = vsel %vm490_vm12, %v1955_v22, %v1956_v37 }
 0x232   : > { %v1949_v27 = vpop.permute.xlu1 %1948  ;;  %v1964_v15 = vpop.permute.xlu0 %1963  ;;  %v1015_v28 = vmul.f32 %v2442_v34, %v1012_v24  ;;  %v1014_v38 = vmul.f32 %v2437_v33, %v1013_v26  ;;  %v1030_v49 = vmul.f32 %v2468_v50, %v1029_v16  ;;  %v1031_v61 = vmul.f32 %v2478_v51, %v1028_v8 }
 0x233   : > { %v1951_v29 = vunpack.i.h.bf16 %v1949_v27  ;;  %v1950_v30 = vunpack.i.l.bf16 %v1949_v27  ;;  %v1966_v35 = vunpack.i.h.bf16 %v1964_v15  ;;  %v1965_v36 = vunpack.i.l.bf16 %v1964_v15 }
 0x234   : > { %v2156_v37 = vmov 1.0  }
 0x235   : > { %v1021_v9 = vsel %vm481_vm5, %v1951_v29, %v1950_v30  ;;  %v1045_v39 = vsel %vm508_vm2, %v1966_v35, %v1965_v36  ;;  %v1020_v42 = vsel %vm481_vm5, %v1950_v30, %v1951_v29  ;;  %v1044_v23 = vsel %vm508_vm2, %v1965_v36, %v1966_v35 }
 0x236   : > { %v1022_v46 = vmul.f32 %v2434_v32, %v1021_v9  ;;  %v1959_v52 = vpop.permute.xlu1 %1958  ;;  %v1073_v53 = vpack.c.bf16 %v1020_v42, %v1015_v28  ;;  %v1974_v55 = vpop.permute.xlu0 %1973  ;;  %v1047_v59 = vmul.f32 %v2506_v1, %v1045_v39  ;;  %v1046_v48 = vmul.f32 %v2503_v0, %v1044_v23 }
 0x237   : > { %v1961_v10 = vunpack.i.h.bf16 %v1959_v52  ;;  %v1960_v11 = vunpack.i.l.bf16 %v1959_v52  ;;  %v1976_v57 = vunpack.i.h.bf16 %v1974_v55  ;;  %v1975_v58 = vunpack.i.l.bf16 %v1974_v55 }
 0x238   : > { %1091 = vmatprep.subr.bf16.mxu0 %v1073_v53  ;;  %v1072_v60 = vpack.c.bf16 %v1022_v46, %v1014_v38  ;;  %v1825_v22 = vpack.c.bf16 %v1047_v59, %v2156_v37  ;;  %v1828_v28 = vpack.c.bf16 %v1046_v48, %v2156_v37 }
 0x239   : > { %v1036_v62 = vsel %vm499_vm15, %v1960_v11, %v1961_v10  ;;  %v1037_v63 = vsel %vm499_vm15, %v1961_v10, %v1960_v11  ;;  %v1061_v19 = vsel %vm526_vm10, %v1976_v57, %v1975_v58  ;;  %v1060_v36 = vsel %vm526_vm10, %v1975_v58, %v1976_v57  ;;  %v2894_v58 = vld [vmem:[%s3142_s4] sm:$0xf] }
 0x23a   : > { %v1038_v44 = vmul.f32 %v2485_v54, %v1037_v63  ;;  %1092 = vmatpush1.bf16.msra.mxu0 %v1072_v60  ;;  %v1969_v4 = vpop.permute.xlu1 %1968  ;;  %v1039_v5 = vmul.f32 %v2442_v34, %v1036_v62  ;;  %v1063_v24 = vmul.f32 %v2539_v47, %v1061_v19 }
 0x23b   : > { %v1971_v14 = vunpack.i.h.bf16 %v1969_v4  ;;  %v1970_v13 = vunpack.i.l.bf16 %v1969_v4 }
 0x23c   : > { %v1075_v6 = vpack.c.bf16 %v1039_v5, %v1031_v61  ;;  %v1074_v20 = vpack.c.bf16 %v1038_v44, %v1030_v49 }
 0x23d   : > { %v1052_v26 = vsel %vm517_vm8, %v1970_v13, %v1971_v14  ;;  %v1053_v27 = vsel %vm517_vm8, %v1971_v14, %v1970_v13 }
 0x23e   : > { %1093 = vmatprep.subr.bf16.mxu0 %v1075_v6  ;;  %v1979_v16 = vpop.permute.xlu1 %1978  ;;  %v1055_v15 = vmul.f32 %v2534_v45, %v1053_v27  ;;  %v1054_v29 = vmul.f32 %v2544_v25, %v1052_v26 }
 0x23f   : > { %1094 = vmatpush1.bf16.msra.mxu0 %v1074_v20  ;;  %v1981_v30 = vunpack.i.h.bf16 %v1979_v16  ;;  %v1980_v35 = vunpack.i.l.bf16 %v1979_v16 }
 0x240   : > { %1826 = vmatprep.subr.msk.bf16.mxu0 %vm1824_vm4, %v1825_v22  ;;  %v1079_v38 = vpack.c.bf16 %v1063_v24, %v1055_v15  ;;  %v1078_v42 = vpack.c.bf16 %v1060_v36, %v1054_v29  ;;  %vm1853_vm4 = vmpackc.low %vm2157_vm1, %vm3154_vm9 }
 0x241   : > { %v1068_v9 = vsel %vm535_vm13, %v1980_v35, %v1981_v30  ;;  %v1069_v8 = vsel %vm535_vm13, %v1981_v30, %v1980_v35 }
 0x242   : > { %v1071_v39 = vmul.f32 %v2572_v21, %v1069_v8  ;;  %v1070_v43 = vmul.f32 %v2503_v0, %v1068_v9 }
 0x243   : > { %1829 = vmatpush1.bf16.msk.msra.mxu0 %vm1827_vm7, %v1828_v28  ;;  %vm1840_vm7 = vmpackc.low %vm2157_vm1, %vm3153_vm3 }
 0x244   : > { %1097 = vmatprep.subr.bf16.mxu0 %v1079_v38  ;;  %v1081_v46 = vpack.c.bf16 %v1071_v39, %v1071_v39  ;;  %v1080_v49 = vpack.c.bf16 %v1070_v43, %v1070_v43 }
 0x246   : > { %v1086_v52 = vsel %vm791_vm11, %v1080_v49, 0 }
 0x247   : > { %1098 = vmatpush1.bf16.msra.mxu0 %v1078_v42 }
 0x248   : > { %1830 = vmatprep.subr.msk.bf16.mxu0 %vm791_vm11, %v1081_v46 }
 0x24a   : > { %v1989_v53 = vpop.permute.xlu0 %1988  ;;  %v1984_v55 = vpop.permute.xlu1 %1983 }
 0x24b   : > { %v1991_v10 = vunpack.i.h.bf16 %v1989_v53  ;;  %v1990_v11 = vunpack.i.l.bf16 %v1989_v53  ;;  %v1986_v57 = vunpack.i.h.bf16 %v1984_v55  ;;  %v1985_v56 = vunpack.i.l.bf16 %v1984_v55  ;;  %1100 = vmatpush1.bf16.msra.mxu0 %v1086_v52 }
 0x24d   : > { %v1191_v23 = vsel %vm481_vm5, %v1991_v10, %v1990_v11  ;;  %v1182_v59 = vsel %vm472_vm6, %v1985_v56, %v1986_v57  ;;  %v1183_v60 = vsel %vm472_vm6, %v1986_v57, %v1985_v56  ;;  %v1190_v61 = vsel %vm481_vm5, %v1990_v11, %v1991_v10 }
 0x24e   : > { %v1192_v62 = vmul.f32 %v2434_v32, %v1191_v23  ;;  %v1184_v63 = vmul.f32 %v2437_v33, %v1183_v60  ;;  %1831 = vmatmul.mubr.msk.bf16.vlgmr.msra.gmra.mrb[8].mxu0 %vm787_vm14, %v2894_v58  ;;  %v1999_v19 = vpop.permute.xlu0 %1998  ;;  %v1994_v44 = vpop.permute.xlu1 %1993  ;;  %v1185_v4 = vmul.f32 %v2442_v34, %v1182_v59 }
 0x24f   : > { %v2001_v5 = vunpack.i.h.bf16 %v1999_v19  ;;  %v2000_v48 = vunpack.i.l.bf16 %v1999_v19  ;;  %v1996_v14 = vunpack.i.h.bf16 %v1994_v44  ;;  %v1995_v13 = vunpack.i.l.bf16 %v1994_v44  ;;  %1459 = vmatprep.mubr.bf16.mxu0 %v2153_v12 }
 0x250   : > { %v1243_v6 = vpack.c.bf16 %v1190_v61, %v1185_v4  ;;  %v1242_v20 = vpack.c.bf16 %v1192_v62, %v1184_v63 }
 0x251   : > { %v1206_v22 = vsel %vm499_vm15, %v2000_v48, %v2001_v5  ;;  %v1207_v24 = vsel %vm499_vm15, %v2001_v5, %v2000_v48  ;;  %v1198_v26 = vsel %vm490_vm12, %v1995_v13, %v1996_v14  ;;  %v1199_v27 = vsel %vm490_vm12, %v1996_v14, %v1995_v13 }
 0x252   : > { %v1208_v16 = vmul.f32 %v2485_v54, %v1207_v24  ;;  %v1200_v15 = vmul.f32 %v2468_v50, %v1199_v27  ;;  %v2004_v28 = vpop.permute.xlu0 %2003  ;;  %v2009_v29 = vpop.permute.xlu1 %2008  ;;  %1258 = vmatprep.subr.bf16.mxu1 %v1243_v6  ;;  %v1201_v30 = vmul.f32 %v2478_v51, %v1198_v26  ;;  %v1209_v35 = vmul.f32 %v2442_v34, %v1206_v22 }
 0x253   : > { %v2006_v36 = vunpack.i.h.bf16 %v2004_v28  ;;  %v2005_v38 = vunpack.i.l.bf16 %v2004_v28  ;;  %v2011_v9 = vunpack.i.h.bf16 %v2009_v29  ;;  %v2010_v8 = vunpack.i.l.bf16 %v2009_v29  ;;  %1259 = vmatpush1.bf16.msra.mxu1 %v1242_v20 }
 0x254   : > { %v1245_v39 = vpack.c.bf16 %v1209_v35, %v1201_v30  ;;  %v1244_v43 = vpack.c.bf16 %v1208_v16, %v1200_v15 }
 0x255   : > { %v1214_v42 = vsel %vm508_vm2, %v2005_v38, %v2006_v36  ;;  %v1215_v46 = vsel %vm508_vm2, %v2006_v36, %v2005_v38  ;;  %v1223_v53 = vsel %vm517_vm8, %v2011_v9, %v2010_v8  ;;  %v1222_v60 = vsel %vm517_vm8, %v2010_v8, %v2011_v9 }
 0x256   : > { %v1216_v49 = vmul.f32 %v2503_v0, %v1214_v42  ;;  %v1217_v52 = vmul.f32 %v2506_v1, %v1215_v46  ;;  %v2014_v55 = vpop.permute.xlu0 %2013  ;;  %v2019_v10 = vpop.permute.xlu1 %2018  ;;  %1260 = vmatprep.subr.bf16.mxu1 %v1245_v39  ;;  %v1225_v44 = vmul.f32 %v2534_v45, %v1223_v53  ;;  %v1224_v17 = vmul.f32 %v2544_v25, %v1222_v60 }
 0x257   : > { %v2016_v11 = vunpack.i.h.bf16 %v2014_v55  ;;  %v2015_v57 = vunpack.i.l.bf16 %v2014_v55  ;;  %v2021_v56 = vunpack.i.h.bf16 %v2019_v10  ;;  %v2020_v23 = vunpack.i.l.bf16 %v2019_v10  ;;  %1261 = vmatpush1.bf16.msra.mxu1 %v1244_v43 }
 0x258   : > { %v1841_v59 = vpack.c.bf16 %v1216_v49, %v2156_v37  ;;  %v1838_v61 = vpack.c.bf16 %v1217_v52, %v2156_v37 }
 0x259   : > { %v1231_v62 = vsel %vm526_vm10, %v2016_v11, %v2015_v57  ;;  %v1238_v63 = vsel %vm535_vm13, %v2020_v23, %v2021_v56  ;;  %v1239_v19 = vsel %vm535_vm13, %v2021_v56, %v2020_v23  ;;  %v1230_v4 = vsel %vm526_vm10, %v2015_v57, %v2016_v11 }
 0x25a   : > { %v1241_v5 = vmul.f32 %v2572_v21, %v1239_v19  ;;  %1839 = vmatprep.subr.msk.bf16.mxu1 %vm1837_vm0, %v1838_v61  ;;  %v1233_v48 = vmul.f32 %v2539_v47, %v1231_v62  ;;  %v1240_v14 = vmul.f32 %v2503_v0, %v1238_v63  ;;  %v1248_v6 = vpack.c.bf16 %v1230_v4, %v1224_v17 }
 0x25b   : > { %1842 = vmatpush1.bf16.msk.msra.mxu1 %vm1840_vm7, %v1841_v59  ;;  %vm3155_vm0 = vcmp.ge.f32.partialorder %v2786_v40, 1.0 }
 0x25c   : > { %v1249_v13 = vpack.c.bf16 %v1233_v48, %v1225_v44  ;;  %v1251_v20 = vpack.c.bf16 %v1241_v5, %v1241_v5  ;;  %v1250_v22 = vpack.c.bf16 %v1240_v14, %v1240_v14  ;;  %vm1856_vm3 = vmpackc.low %vm2157_vm1, %vm3155_vm0 }
 0x25e   : > { %1264 = vmatprep.subr.bf16.mxu1 %v1249_v13  ;;  %v1253_v24 = vsel %vm791_vm11, %v1250_v22, 0 }
 0x25f   : > { %1265 = vmatpush1.bf16.msra.mxu1 %v1248_v6 }
 0x260   : > { %1843 = vmatprep.subr.msk.bf16.mxu1 %vm791_vm11, %v1251_v20 }
 0x263   : > { %1267 = vmatpush1.bf16.msra.mxu1 %v1253_v24 }
 0x266   : > { %1844 = vmatmul.mubr.msk.bf16.vlgmr.msra.gmra.mrb[8].mxu1 %vm787_vm14, %v2894_v58 }
 0x267   : > { %1624 = vmatprep.mubr.bf16.mxu1 %v2153_v12 }
 0x26a   : > { %v2029_v7 = vpop.permute.xlu0 %2028  ;;  %v2024_v26 = vpop.permute.xlu1 %2023 }
 0x26b   : > { %v2031_v27 = vunpack.i.h.bf16 %v2029_v7  ;;  %v2030_v16 = vunpack.i.l.bf16 %v2029_v7  ;;  %v2026_v15 = vunpack.i.h.bf16 %v2024_v26  ;;  %v2025_v28 = vunpack.i.l.bf16 %v2024_v26 }
 0x26d   : > { %v1360_v29 = vsel %vm481_vm5, %v2031_v27, %v2030_v16  ;;  %v1351_v30 = vsel %vm472_vm6, %v2025_v28, %v2026_v15  ;;  %v1352_v35 = vsel %vm472_vm6, %v2026_v15, %v2025_v28  ;;  %v1359_v39 = vsel %vm481_vm5, %v2030_v16, %v2031_v27 }
 0x26e   : > { %v1361_v36 = vmul.f32 %v2434_v32, %v1360_v29  ;;  %v1353_v38 = vmul.f32 %v2437_v33, %v1352_v35  ;;  %v2034_v12 = vpop.permute.xlu0 %2033  ;;  %v2039_v9 = vpop.permute.xlu1 %2038  ;;  %v1354_v8 = vmul.f32 %v2442_v34, %v1351_v30 }
 0x26f   : > { %v2036_v43 = vunpack.i.h.bf16 %v2034_v12  ;;  %v2035_v42 = vunpack.i.l.bf16 %v2034_v12  ;;  %v2041_v46 = vunpack.i.h.bf16 %v2039_v9  ;;  %v2040_v49 = vunpack.i.l.bf16 %v2039_v9 }
 0x270   : > { %v1412_v52 = vpack.c.bf16 %v1359_v39, %v1354_v8  ;;  %v1411_v53 = vpack.c.bf16 %v1361_v36, %v1353_v38 }
 0x271   : > { %v1367_v55 = vsel %vm490_vm12, %v2035_v42, %v2036_v43  ;;  %v1368_v10 = vsel %vm490_vm12, %v2036_v43, %v2035_v42  ;;  %v1375_v11 = vsel %vm499_vm15, %v2040_v49, %v2041_v46  ;;  %v1376_v57 = vsel %vm499_vm15, %v2041_v46, %v2040_v49 }
 0x272   : > { %v1369_v56 = vmul.f32 %v2468_v50, %v1368_v10  ;;  %v1377_v23 = vmul.f32 %v2485_v54, %v1376_v57  ;;  %v2044_v59 = vpop.permute.xlu0 %2043  ;;  %v2049_v60 = vpop.permute.xlu1 %2048  ;;  %1427 = vmatprep.subr.bf16.mxu0 %v1412_v52  ;;  %v1370_v61 = vmul.f32 %v2478_v51, %v1367_v55  ;;  %v1378_v62 = vmul.f32 %v2442_v34, %v1375_v11 }
 0x273   : > { %v2046_v63 = vunpack.i.h.bf16 %v2044_v59  ;;  %v2045_v19 = vunpack.i.l.bf16 %v2044_v59  ;;  %v2051_v44 = vunpack.i.h.bf16 %v2049_v60  ;;  %v2050_v4 = vunpack.i.l.bf16 %v2049_v60  ;;  %1428 = vmatpush1.bf16.msra.mxu0 %v1411_v53 }
 0x274   : > { %v1414_v5 = vpack.c.bf16 %v1378_v62, %v1370_v61  ;;  %v1413_v48 = vpack.c.bf16 %v1377_v23, %v1369_v56 }
 0x275   : > { %v1383_v14 = vsel %vm508_vm2, %v2045_v19, %v2046_v63  ;;  %v1384_v17 = vsel %vm508_vm2, %v2046_v63, %v2045_v19  ;;  %v1392_v20 = vsel %vm517_vm8, %v2051_v44, %v2050_v4  ;;  %v1391_v28 = vsel %vm517_vm8, %v2050_v4, %v2051_v44 }
 0x276   : > { %v1385_v13 = vmul.f32 %v2503_v0, %v1383_v14  ;;  %v1386_v6 = vmul.f32 %v2506_v1, %v1384_v17  ;;  %v2054_v22 = vpop.permute.xlu0 %2053  ;;  %v2059_v24 = vpop.permute.xlu1 %2058  ;;  %1429 = vmatprep.subr.bf16.mxu0 %v1414_v5  ;;  %v1394_v38 = vmul.f32 %v2534_v45, %v1392_v20  ;;  %v1393_v41 = vmul.f32 %v2544_v25, %v1391_v28 }
 0x277   : > { %v2056_v7 = vunpack.i.h.bf16 %v2054_v22  ;;  %v2055_v26 = vunpack.i.l.bf16 %v2054_v22  ;;  %v2061_v27 = vunpack.i.h.bf16 %v2059_v24  ;;  %v2060_v16 = vunpack.i.l.bf16 %v2059_v24  ;;  %1430 = vmatpush1.bf16.msra.mxu0 %v1413_v48 }
 0x278   : > { %v1857_v15 = vpack.c.bf16 %v1385_v13, %v2156_v37  ;;  %v1854_v29 = vpack.c.bf16 %v1386_v6, %v2156_v37 }
 0x279   : > { %v1400_v30 = vsel %vm526_vm10, %v2056_v7, %v2055_v26  ;;  %v1407_v35 = vsel %vm535_vm13, %v2060_v16, %v2061_v27  ;;  %v1408_v36 = vsel %vm535_vm13, %v2061_v27, %v2060_v16  ;;  %v1399_v12 = vsel %vm526_vm10, %v2055_v26, %v2056_v7 }
 0x27a   : > { %v1410_v9 = vmul.f32 %v2572_v21, %v1408_v36  ;;  %1855 = vmatprep.subr.msk.bf16.mxu0 %vm1853_vm4, %v1854_v29  ;;  %v1402_v8 = vmul.f32 %v2539_v47, %v1400_v30  ;;  %v1409_v39 = vmul.f32 %v2503_v0, %v1407_v35  ;;  %v1417_v42 = vpack.c.bf16 %v1399_v12, %v1393_v41 }
 0x27b   : > { %1858 = vmatpush1.bf16.msk.msra.mxu0 %vm1856_vm3, %v1857_v15 }
 0x27c   : > { %v1418_v43 = vpack.c.bf16 %v1402_v8, %v1394_v38  ;;  %v1420_v46 = vpack.c.bf16 %v1410_v9, %v1410_v9  ;;  %v1419_v49 = vpack.c.bf16 %v1409_v39, %v1409_v39 }
 0x27e   : > { %1433 = vmatprep.subr.bf16.mxu0 %v1418_v43  ;;  %v1422_v40 = vsel %vm791_vm11, %v1419_v49, 0 }
 0x27f   : > { %1434 = vmatpush1.bf16.msra.mxu0 %v1417_v42 }
 0x280   : > { %1859 = vmatprep.subr.msk.bf16.mxu0 %vm791_vm11, %v1420_v46 }
 0x282   : > { %v2069_v52 = vpop.permute.xlu0 %2068  ;;  %v2064_v53 = vpop.permute.xlu1 %2063 }
 0x283   : > { %v2071_v55 = vunpack.i.h.bf16 %v2069_v52  ;;  %v2070_v10 = vunpack.i.l.bf16 %v2069_v52  ;;  %v2066_v11 = vunpack.i.h.bf16 %v2064_v53  ;;  %v2065_v57 = vunpack.i.l.bf16 %v2064_v53  ;;  %1436 = vmatpush1.bf16.msra.mxu0 %v1422_v40 }
 0x285   : > { %v1525_v56 = vsel %vm481_vm5, %v2071_v55, %v2070_v10  ;;  %v1516_v23 = vsel %vm472_vm6, %v2065_v57, %v2066_v11  ;;  %v1517_v59 = vsel %vm472_vm6, %v2066_v11, %v2065_v57  ;;  %v1524_v44 = vsel %vm481_vm5, %v2070_v10, %v2071_v55 }
 0x286   : > { %v1526_v60 = vmul.f32 %v2434_v32, %v1525_v56  ;;  %v1518_v61 = vmul.f32 %v2437_v33, %v1517_v59  ;;  %1860 = vmatmul.mubr.msk.bf16.vlgmr.msra.gmra.mrb[12].mxu0 %vm787_vm14, %v2894_v58  ;;  %v2074_v62 = vpop.permute.xlu0 %2073  ;;  %v2079_v63 = vpop.permute.xlu1 %2078  ;;  %v1519_v19 = vmul.f32 %v2442_v34, %v1516_v23  ;;  %vm3156_vm5 = vcmp.ge.f32.partialorder %v2814_v3, 1.0  ;;  %v1133_v59 = vld [vmem:[%s2263_s26 + $0x8] sm:$0xff] }
 0x287   : > { %v2076_v4 = vunpack.i.h.bf16 %v2074_v62  ;;  %v2075_v5 = vunpack.i.l.bf16 %v2074_v62  ;;  %v2081_v48 = vunpack.i.h.bf16 %v2079_v63  ;;  %v2080_v14 = vunpack.i.l.bf16 %v2079_v63  ;;  %vm1869_vm6 = vmpackc.low %vm2157_vm1, %vm3156_vm5 }
 0x288   : > { %v1577_v17 = vpack.c.bf16 %v1524_v44, %v1519_v19  ;;  %v1576_v13 = vpack.c.bf16 %v1526_v60, %v1518_v61  ;;  %v3079_v60 = vstv %s1793_s29 }
 0x289   : > { %v1532_v32 = vsel %vm490_vm12, %v2075_v5, %v2076_v4  ;;  %v1533_v33 = vsel %vm490_vm12, %v2076_v4, %v2075_v5  ;;  %v1540_v6 = vsel %vm499_vm15, %v2080_v14, %v2081_v48  ;;  %v1541_v20 = vsel %vm499_vm15, %v2081_v48, %v2080_v14 }
 0x28a   : > { %v1534_v22 = vmul.f32 %v2468_v50, %v1533_v33  ;;  %v1542_v24 = vmul.f32 %v2485_v54, %v1541_v20  ;;  %v2084_v7 = vpop.permute.xlu0 %2083  ;;  %v2089_v26 = vpop.permute.xlu1 %2088  ;;  %1592 = vmatprep.subr.bf16.mxu1 %v1577_v17  ;;  %v1535_v27 = vmul.f32 %v2478_v51, %v1532_v32  ;;  %v1543_v16 = vmul.f32 %v2442_v34, %v1540_v6  ;;  %v1845_v32 = vld [vmem:[%s2263_s26 + $0x10] sm:$0xff] }
 0x28b   : > { %v2086_v15 = vunpack.i.h.bf16 %v2084_v7  ;;  %v2085_v28 = vunpack.i.l.bf16 %v2084_v7  ;;  %v2091_v29 = vunpack.i.h.bf16 %v2089_v26  ;;  %v2090_v30 = vunpack.i.l.bf16 %v2089_v26  ;;  %1593 = vmatpush1.bf16.msra.mxu1 %v1576_v13 }
 0x28c   : > { %v1579_v35 = vpack.c.bf16 %v1543_v16, %v1535_v27  ;;  %v1578_v36 = vpack.c.bf16 %v1542_v24, %v1534_v22  ;;  %vm3157_vm12 = vcmp.ge.f32.partialorder %v2812_v2, 1.0  ;;  %v1846_v22 = vld [vmem:[%s2263_s26 + $0x18] sm:$0xff] }
 0x28d   : > { %v1548_v38 = vsel %vm508_vm2, %v2085_v28, %v2086_v15  ;;  %v1549_v50 = vsel %vm508_vm2, %v2086_v15, %v2085_v28  ;;  %v1557_v34 = vsel %vm517_vm8, %v2091_v29, %v2090_v30  ;;  %v1556_v46 = vsel %vm517_vm8, %v2090_v30, %v2091_v29  ;;  %vm1872_vm15 = vmpackc.low %vm2157_vm1, %vm3157_vm12 }
 0x28e   : > { %v1550_v54 = vmul.f32 %v2503_v0, %v1548_v38  ;;  %v1551_v12 = vmul.f32 %v2506_v1, %v1549_v50  ;;  %v2094_v51 = vpop.permute.xlu0 %2093  ;;  %v2099_v9 = vpop.permute.xlu1 %2098  ;;  %1594 = vmatprep.subr.bf16.mxu1 %v1579_v35  ;;  %v1559_v40 = vmul.f32 %v2534_v45, %v1557_v34  ;;  %v1558_v3 = vmul.f32 %v2544_v25, %v1556_v46  ;;  %v1132_v25 = vld [vmem:[%s2263_s26] sm:$0xff] }
 0x28f   : > { %v2096_v8 = vunpack.i.h.bf16 %v2094_v51  ;;  %v2095_v39 = vunpack.i.l.bf16 %v2094_v51  ;;  %v2101_v41 = vunpack.i.h.bf16 %v2099_v9  ;;  %v2100_v43 = vunpack.i.l.bf16 %v2099_v9  ;;  %1595 = vmatpush1.bf16.msra.mxu1 %v1578_v36 }
 0x290   : > { %v1873_v42 = vpack.c.bf16 %v1550_v54, %v2156_v37  ;;  %v1870_v49 = vpack.c.bf16 %v1551_v12, %v2156_v37 }
 0x291   : > { %v1565_v1 = vsel %vm526_vm10, %v2096_v8, %v2095_v39  ;;  %v1572_v52 = vsel %vm535_vm13, %v2100_v43, %v2101_v41  ;;  %v1573_v53 = vsel %vm535_vm13, %v2101_v41, %v2100_v43  ;;  %v1564_v55 = vsel %vm526_vm10, %v2095_v39, %v2096_v8  ;;  %v1861_v8 = vld [vmem:[%s2263_s26 + $0x20] sm:$0xff] }
 0x292   : > { %v1575_v37 = vmul.f32 %v2572_v21, %v1573_v53  ;;  %1871 = vmatprep.subr.msk.bf16.mxu1 %vm1869_vm6, %v1870_v49  ;;  %v1567_v10 = vmul.f32 %v2539_v47, %v1565_v1  ;;  %v1574_v11 = vmul.f32 %v2503_v0, %v1572_v52  ;;  %v1582_v45 = vpack.c.bf16 %v1564_v55, %v1558_v3 }
 0x293   : > { %1874 = vmatpush1.bf16.msk.msra.mxu1 %vm1872_vm15, %v1873_v42  ;;  %v1862_v42 = vld [vmem:[%s2263_s26 + $0x28] sm:$0xff] }
 0x294   : > { %v1583_v57 = vpack.c.bf16 %v1567_v10, %v1559_v40  ;;  %v1585_v18 = vpack.c.bf16 %v1575_v37, %v1575_v37  ;;  %v1584_v56 = vpack.c.bf16 %v1574_v11, %v1574_v11 }
 0x296   : > { %1598 = vmatprep.subr.bf16.mxu1 %v1583_v57  ;;  %v1587_v21 = vsel %vm791_vm11, %v1584_v56, 0 }
 0x297   : > { %1599 = vmatpush1.bf16.msra.mxu1 %v1582_v45 }
 0x298   : > { %1875 = vmatprep.subr.msk.bf16.mxu1 %vm791_vm11, %v1585_v18 }
 0x29b   : > { %1601 = vmatpush1.bf16.msra.mxu1 %v1587_v21 }
 0x29e   : > { %1876 = vmatmul.mubr.msk.bf16.vlgmr.msra.gmra.mrb[12].mxu1 %vm787_vm14, %v2894_v58 }
 0x29f   : > { %v3074_v0 = vpop.permute.xlu0 %463 }
 0x321   : > { %v1125_v47 = vpop.f32.mrb[8].mxu0 }
 0x322   : > { %v1126_v2 = vadd.f32 %v1125_v47, %v3074_v0  ;;  %v1127_v23 = vpop.f32.mrb[9].mxu0 }
 0x323   : > { %v1128_v61 = vadd.f32 %v1127_v23, %v3074_v0  ;;  %v1129_v62 = vpop.f32.mrb[10].mxu0 }
 0x324   : > { %v1134_v63 = vadd.f32 %v1132_v25, %v1126_v2  ;;  %v1130_v19 = vpop.f32.mrb[11].mxu0  ;;  %v1877_v2 = vld [vmem:[%s2263_s26 + $0x30] sm:$0xff]  ;;  %v1878_v62 = vld [vmem:[%s2263_s26 + $0x38] sm:$0xff] }
 0x325   : > { %v1135_v44 = vadd.f32 %v1133_v59, %v1128_v61 }
 0x326   : > { %v1137_v58 = vmul.f32 %v3079_v60, %v1134_v63 }
 0x327   : > { %v1138_v4 = vmul.f32 %v3079_v60, %v1135_v44 }
 0x328   : > { %vm1141_vm2 = vcmp.ge.f32.partialorder %v1137_v58, 1.0 }
 0x329   : > { %v1832_v5 = vsel %vm1141_vm2, 1.0, %v2155_v31  ;;  %vm1142_vm8 = vcmp.ge.f32.partialorder %v1138_v4, 1.0 }
 0x32a   : > { %v1833_v48 = vsel %vm1142_vm8, 1.0, %v2155_v31  ;;  %v1147_v17 = vsub.f32 1.0, %v1832_v5 }
 0x32b   : > { %v1889_v14 = vpack.c.bf16 %v1833_v48, %v1832_v5  ;;  %v1148_v33 = vsub.f32 1.0, %v1833_v48 }
 0x32c   : > { %v1149_v26 = vmul.f32 %v1147_v17, %v1137_v58 }
 0x32d   : > { %1159 = vst [vmem:[%s3088_s8] sm:$0xff] %v1889_v14  ;;  %v1150_v15 = vmul.f32 %v1148_v33, %v1138_v4 }
 0x339   : > { %v1292_v13 = vpop.f32.mrb[8].mxu1 }
 0x33a   : > { %v1293_v6 = vadd.f32 %v1292_v13, %v3074_v0  ;;  %v1294_v20 = vpop.f32.mrb[9].mxu1 }
 0x33b   : > { %v1295_v24 = vadd.f32 %v1294_v20, %v3074_v0  ;;  %v1296_v7 = vpop.f32.mrb[10].mxu1 }
 0x33c   : > { %v1301_v27 = vadd.f32 %v1845_v32, %v1293_v6  ;;  %v1297_v16 = vpop.f32.mrb[11].mxu1 }
 0x33d   : > { %v1302_v28 = vadd.f32 %v1846_v22, %v1295_v24 }
 0x33e   : > { %v1303_v29 = vsub.f32 %v1301_v27, %v1149_v26 }
 0x33f   : > { %v1304_v30 = vsub.f32 %v1302_v28, %v1150_v15 }
 0x340   : > { %v1305_v35 = vmul.f32 %v1303_v29, %v3079_v60 }
 0x341   : > { %v1306_v36 = vmul.f32 %v1304_v30, %v3079_v60 }
 0x342   : > { %v1307_v38 = vadd.f32 %v1305_v35, %v1149_v26 }
 0x343   : > { %v1308_v50 = vadd.f32 %v1306_v36, %v1150_v15 }
 0x344   : > { %vm1309_vm10 = vcmp.ge.f32.partialorder %v1307_v38, 1.0 }
 0x345   : > { %v1847_v54 = vsel %vm1309_vm10, 1.0, %v2155_v31  ;;  %vm1310_vm13 = vcmp.ge.f32.partialorder %v1308_v50, 1.0 }
 0x346   : > { %v1848_v12 = vsel %vm1310_vm13, 1.0, %v2155_v31  ;;  %v1315_v51 = vsub.f32 1.0, %v1847_v54 }
 0x347   : > { %v1890_v34 = vpack.c.bf16 %v1848_v12, %v1847_v54  ;;  %v1316_v39 = vsub.f32 1.0, %v1848_v12 }
 0x348   : > { %v1317_v1 = vmul.f32 %v1315_v51, %v1307_v38 }
 0x349   : > { %1850 = vst [vmem:[%s3088_s8 + $0x8] sm:$0xff] %v1890_v34  ;;  %v1318_v40 = vmul.f32 %v1316_v39, %v1308_v50 }
 0x350   : > { %v1704_v24 = vld [vmem:[%s3088_s8 + $0x8] sm:$0xff] (%p3158_p4) }
 0x351   : > { %1705 = vst [vmem:[%s1668_s9 + $0x10] sm:$0xff] (%p3158_p4), %v1704_v24 }
 0x359   : > { %v1461_v9 = vpop.f32.mrb[12].mxu0 }
 0x35a   : > { %v1462_v41 = vadd.f32 %v1461_v9, %v3074_v0  ;;  %v1463_v43 = vpop.f32.mrb[13].mxu0 }
 0x35b   : > { %v1464_v46 = vadd.f32 %v1463_v43, %v3074_v0  ;;  %v1465_v49 = vpop.f32.mrb[14].mxu0 }
 0x35c   : > { %v1470_v52 = vadd.f32 %v1861_v8, %v1462_v41  ;;  %v1466_v53 = vpop.f32.mrb[15].mxu0 }
 0x35d   : > { %v1471_v55 = vadd.f32 %v1862_v42, %v1464_v46 }
 0x35e   : > { %v1472_v37 = vsub.f32 %v1470_v52, %v1317_v1 }
 0x35f   : > { %v1473_v10 = vsub.f32 %v1471_v55, %v1318_v40 }
 0x360   : > { %v1474_v11 = vmul.f32 %v1472_v37, %v3079_v60 }
 0x361   : > { %v1475_v3 = vmul.f32 %v1473_v10, %v3079_v60 }
 0x362   : > { %v1476_v57 = vadd.f32 %v1474_v11, %v1317_v1 }
 0x363   : > { %v1477_v45 = vadd.f32 %v1475_v3, %v1318_v40 }
 0x364   : > { %vm1478_vm11 = vcmp.ge.f32.partialorder %v1476_v57, 1.0 }
 0x365   : > { %v1863_v18 = vsel %vm1478_vm11, 1.0, %v2155_v31  ;;  %vm1479_vm14 = vcmp.ge.f32.partialorder %v1477_v45, 1.0 }
 0x366   : > { %v1864_v56 = vsel %vm1479_vm14, 1.0, %v2155_v31  ;;  %v1484_v47 = vsub.f32 1.0, %v1863_v18 }
 0x367   : > { %v1891_v21 = vpack.c.bf16 %v1864_v56, %v1863_v18  ;;  %v1485_v23 = vsub.f32 1.0, %v1864_v56 }
 0x368   : > { %v1486_v44 = vmul.f32 %v1484_v47, %v1476_v57 }
 0x369   : > { %1866 = vst [vmem:[%s3088_s8 + $0x10] sm:$0xff] %v1891_v21  ;;  %v1487_v5 = vmul.f32 %v1485_v23, %v1477_v45 }
 0x370   : > { %v1706_v7 = vld [vmem:[%s3088_s8 + $0x10] sm:$0xff] (%p3158_p4) }
 0x371   : > { %v1626_v25 = vpop.f32.mrb[12].mxu1  ;;  %1707 = vst [vmem:[%s1668_s9 + $0x20] sm:$0xff] (%p3158_p4), %v1706_v7 }
 0x372   : > { %v1627_v59 = vadd.f32 %v1626_v25, %v3074_v0  ;;  %v1628_v61 = vpop.f32.mrb[13].mxu1 }
 0x373   : > { %v1629_v63 = vadd.f32 %v1628_v61, %v3074_v0  ;;  %v1630_v19 = vpop.f32.mrb[14].mxu1 }
 0x374   : > { %v1635_v58 = vadd.f32 %v1877_v2, %v1627_v59  ;;  %v1631_v4 = vpop.f32.mrb[15].mxu1 }
 0x375   : > { %v1636_v48 = vadd.f32 %v1878_v62, %v1629_v63 }
 0x376   : > { %v1637_v14 = vsub.f32 %v1635_v58, %v1486_v44 }
 0x377   : > { %v1638_v17 = vsub.f32 %v1636_v48, %v1487_v5 }
 0x378   : > { %v1639_v13 = vmul.f32 %v1637_v14, %v3079_v60 }
 0x379   : > { %v1640_v32 = vmul.f32 %v1638_v17, %v3079_v60  ;;  %v1702_v60 = vld [vmem:[%s3088_s8] sm:$0xff] (%p3158_p4) }
 0x37a   : > { %v1641_v33 = vadd.f32 %v1639_v13, %v1486_v44  ;;  %1703 = vst [vmem:[%s1668_s9] sm:$0xff] (%p3158_p4), %v1702_v60 }
 0x37b   : > { %v1642_v6 = vadd.f32 %v1640_v32, %v1487_v5  ;;  %1665 = sbr.rel (!%p3158_p4) target bundleno = 906 (0x38a), region = 75 }
 0x37c   : > { %vm1643_vm1 = vcmp.ge.f32.partialorder %v1641_v33, 1.0 }
 0x37d   : > { %v1879_v20 = vsel %vm1643_vm1, 1.0, %v2155_v31  ;;  %vm1644_vm7 = vcmp.ge.f32.partialorder %v1642_v6, 1.0 }
 0x37e   : > { %v1880_v0 = vsel %vm1644_vm7, 1.0, %v2155_v31 }
 0x37f   : > { %v1892_v22 = vpack.c.bf16 %v1880_v0, %v1879_v20 }
 0x381   : > { %1882 = vst [vmem:[%s3088_s8 + $0x18] sm:$0xff] %v1892_v22 }
 0x388   : > { %v1708_v26 = vld [vmem:[%s3088_s8 + $0x18] sm:$0xff] }
 0x389   : > { %1709 = vst [vmem:[%s1668_s9 + $0x30] sm:$0xff] %v1708_v26 }
 0x38a PF: > { %p14_p5 = scmp.ge.s32.totalorder %s2212_s25, 4   ;;  %s3159_s21 = smov %s2139_s22 }
 0x38b   : > { %s3160_s22 = smov %s2222_s28  ;;  %s3161_s23 = smov %s2212_s25 }
 0x38c   :  { %16 = sbr.rel (!%p14_p5) target bundleno = 2 (0x2), region = 154 }
 0x393   :  { %1725 = vsyncpa [#allocation4], 1 }
 0x394   :  { %1727 = vsyncpa [#allocation4 + $0x1], 1 }

</bundles_post_ra>
